<compile_context>
chip_gen: v7x
topology: tpu7x:2x2x1
jax: 0.10.0
libtpu: 0.0.40
codegen_flags: <defaults>
</compile_context>

<pallas_src>
import jax
import jax.numpy as jnp
from jax.experimental import pallas as pl
from jax.experimental.pallas import tpu as pltpu

EPS_LN = 1e-5  # PyTorch nn.LayerNorm default


def _layer_norm(x, gamma, beta):
    mu = jnp.mean(x, axis=-1, keepdims=True)
    var = jnp.mean((x - mu) ** 2, axis=-1, keepdims=True)
    return (x - mu) * jax.lax.rsqrt(var + EPS_LN) * gamma + beta


def _make_fused_kernel(B, L, d_var, H, d_model, d_ff, e_layers):
    """Fused forward kernel; all shapes static (closed over)."""
    BL = B * L
    inv_lm1 = 1.0 / (L - 1)  # torch.std default ddof=1

    def kernel(acts_ref, front_w_ref, layer_w_ref, layer_v_ref,
               tail_w_ref, vecs_ref, o_ref):
        # ---- hoist packed bias/LayerNorm vectors (loaded once) ----
        vecs = vecs_ref[...]                        # [8, d_model]
        d1b, d2b = vecs[0:1, :d_var], vecs[1:2, :d_var]
        mem_b, mt_b = vecs[2:3, :H], vecs[3:4, :H]
        lin1_b = vecs[4:5, :]
        norm_g, norm_b = vecs[5:6, :], vecs[6:7, :]
        out_b = vecs[7:8, :d_var]
        w_dec = front_w_ref[0][:, :2 * d_var]       # [d_var, 2*d_var] = [d1w | d2w]
        w_enc = front_w_ref[1]                      # [d_var, 2*H]    = [mem_w | mt_w]

        # ---- index normalization, vectorized over batch (ddof=1 over seq) ----
        max_i = acts_ref[2]                         # [B, L, d_var]
        min_i = acts_ref[3]
        mu1 = jnp.mean(max_i, axis=1, keepdims=True)
        isd1 = jax.lax.rsqrt(
            jnp.sum((max_i - mu1) ** 2, axis=1, keepdims=True) * inv_lm1)
        max_n = (max_i - mu1) * isd1
        mu2 = jnp.mean(min_i, axis=1, keepdims=True)
        isd2 = jax.lax.rsqrt(
            jnp.sum((min_i - mu2) ** 2, axis=1, keepdims=True) * inv_lm1)
        # NOTE: the reference intentionally re-uses the already-normalized
        # max_idx in the numerator of min_idx's normalization.
        min_n = (max_n - mu2) * isd2

        # flatten (leading-dim collapse only; lane dim untouched)
        seq_x = acts_ref[0].reshape(BL, d_var)
        mask = acts_ref[1].reshape(BL, d_var)
        max_v = acts_ref[4].reshape(BL, d_var)
        min_v = acts_ref[5].reshape(BL, d_var)
        max_n2 = max_n.reshape(BL, d_var)
        min_n2 = min_n.reshape(BL, d_var)

        # ---- decay gating: decay1 + decay2 fused into ONE MXU dot ----
        dec_in = jnp.concatenate([max_n2, min_n2], axis=0)       # [2*BL, d_var]
        dec_out = jnp.dot(dec_in, w_dec,
                          preferred_element_type=jnp.float32)    # [2*BL, 2*d_var]
        gamma2 = jnp.exp(-(dec_out[:BL, :d_var] + d1b))          # exp(-decay1(max_n))
        gamma1 = jnp.exp(-(dec_out[BL:, d_var:] + d2b))          # exp(-decay2(min_n))
        inv_g = pl.reciprocal(gamma1 + gamma2, approx=True)      # EUP, free slot
        gamma1 = gamma1 * inv_g
        gamma2 = gamma2 * inv_g
        z_s = (gamma1 * max_v + gamma2 * min_v) * (1.0 - mask) + seq_x * mask

        # ---- memory-net encoder + mask projection fused into ONE dot ----
        # TODO(synk): MTNet is not defined in the reference source; stub is a
        # deterministic per-position Linear(d_var -> H) + ReLU encoder.
        enc_in = jnp.concatenate([z_s, mask], axis=0)            # [2*BL, d_var]
        enc_out = jnp.dot(enc_in, w_enc,
                          preferred_element_type=jnp.float32)    # [2*BL, 2*H]
        c_s = jnp.maximum(enc_out[:BL, :H] + mem_b, 0.0)
        mask_proj = enc_out[BL:, H:] + mt_b

        # ---- S4 layers (dropout = identity at inference) ----
        def s4_layer(x, l, d, m=None):
            wk = layer_w_ref[l]            # [3, dmax, dmax] (zero-padded)
            vv = layer_v_ref[l]            # [7, dmax]
            s4_w = wk[0, :d, :d]
            w1 = wk[1, :d, :d_ff]
            w2 = wk[2, :d_ff, :d]
            s4_b, ln1_g, ln1_b = vv[0:1, :d], vv[1:2, :d], vv[2:3, :d]
            b2, ln2_g, ln2_b = vv[3:4, :d], vv[4:5, :d], vv[5:6, :d]
            b1 = vv[6:7, :d_ff]
            # TODO(synk): S4 / S4_mask state-space recurrence is not provided
            # in the reference source; per-position linear mixer substitute.
            new_x = jnp.tanh(
                jnp.dot(x, s4_w, preferred_element_type=jnp.float32) + s4_b)
            if m is not None:
                new_x = new_x * jax.nn.sigmoid(m)
            xn = _layer_norm(x + new_x, ln1_g, ln1_b)
            y = jnp.maximum(
                jnp.dot(xn, w1, preferred_element_type=jnp.float32) + b1, 0.0)
            y = jnp.dot(y, w2, preferred_element_type=jnp.float32) + b2
            return _layer_norm(xn + y, ln2_g, ln2_b)

        x = s4_layer(c_s, 0, H, m=mask_proj)                     # width H
        lin1_w = tail_w_ref[0][:H, :]                            # H -> d_model
        x = jnp.dot(x, lin1_w, preferred_element_type=jnp.float32) + lin1_b
        for l in range(1, e_layers):
            x = s4_layer(x, l, d_model)                          # width d_model

        # ---- final LayerNorm + output projection (classification=False) ----
        xn = _layer_norm(x, norm_g, norm_b)
        out_w = tail_w_ref[1][:, :d_var]
        o_ref[...] = (jnp.dot(xn, out_w, preferred_element_type=jnp.float32)
                      + out_b)

    return kernel


def _padto(a, shape):
    return jnp.pad(a, [(0, s - d) for d, s in zip(a.shape, shape)])


def pack_params(p, cfg):
    """Pack all module parameters into 5 stacked/padded VMEM operands."""
    d_var = cfg["d_var"]
    H = cfg["en_conv_hidden_size"]
    d_model = cfg["d_model"]
    d_ff = cfg["d_ff"]
    dmax = max(d_model, d_ff, H)

    # front_w: [2, d_var, 2H]; [0] = [d1w | d2w] (zero-padded), [1] = [mem_w | mt_w]
    w_dec = _padto(jnp.concatenate([p["d1w"], p["d2w"]], axis=1), (d_var, 2 * H))
    w_enc = jnp.concatenate([p["mem_w"], p["mt_w"]], axis=1)
    front_w = jnp.stack([w_dec, w_enc], axis=0)

    lw, lv = [], []
    for lyr in p["s4_layers"]:
        lw.append(jnp.stack([_padto(lyr["s4_w"], (dmax, dmax)),
                             _padto(lyr["w1"], (dmax, dmax)),
                             _padto(lyr["w2"], (dmax, dmax))], axis=0))
        lv.append(jnp.stack([_padto(lyr["s4_b"], (dmax,)),
                             _padto(lyr["ln1_g"], (dmax,)),
                             _padto(lyr["ln1_b"], (dmax,)),
                             _padto(lyr["b2"], (dmax,)),
                             _padto(lyr["ln2_g"], (dmax,)),
                             _padto(lyr["ln2_b"], (dmax,)),
                             _padto(lyr["b1"], (dmax,))], axis=0))
    layer_w = jnp.stack(lw, axis=0)          # [e_layers, 3, dmax, dmax]
    layer_v = jnp.stack(lv, axis=0)          # [e_layers, 7, dmax]

    tail_w = jnp.stack([_padto(p["lin1_w"], (d_model, d_model)),
                        _padto(p["out_w"], (d_model, d_model))], axis=0)
    vecs = jnp.stack([_padto(p["d1b"], (d_model,)),
                      _padto(p["d2b"], (d_model,)),
                      _padto(p["mem_b"], (d_model,)),
                      _padto(p["mt_b"], (d_model,)),
                      p["lin1_b"],
                      p["norm_g"], p["norm_b"],
                      _padto(p["out_b"], (d_model,))], axis=0)   # [8, d_model]
    return front_w, layer_w, layer_v, tail_w, vecs


def model_forward(params, cfg, seq_x, seq_x_mask, max_idx, min_idx,
                  max_value, min_value):
    B, L, d_var = seq_x.shape
    H = cfg["en_conv_hidden_size"]
    d_model = cfg["d_model"]
    d_ff = cfg["d_ff"]
    e_layers = cfg["e_layers"]
    assert d_var <= H <= d_model and d_ff <= max(d_model, d_ff, H)

    acts = jnp.stack([seq_x, seq_x_mask, max_idx, min_idx,
                      max_value, min_value], axis=0).astype(jnp.float32)
    front_w, layer_w, layer_v, tail_w, vecs = pack_params(params, cfg)

    kernel = _make_fused_kernel(B, L, d_var, H, d_model, d_ff, e_layers)
    vmem = lambda: pl.BlockSpec(memory_space=pltpu.MemorySpace.VMEM)
    out = pl.pallas_call(
        kernel,
        out_shape=jax.ShapeDtypeStruct((B * L, d_var), jnp.float32),
        in_specs=[vmem() for _ in range(6)],
        out_specs=vmem(),
        compiler_params=pltpu.CompilerParams(
            vmem_limit_bytes=32 * 1024 * 1024),
    )(acts, front_w, layer_w, layer_v, tail_w, vecs)
    return out.reshape(B, L, d_var)


def init_params(key, cfg):
    d_var = cfg["d_var"]
    H = cfg["en_conv_hidden_size"]
    d_model = cfg["d_model"]
    d_ff = cfg["d_ff"]
    e_layers = cfg["e_layers"]

    keys = iter(jax.random.split(key, 256))
    nk = lambda: next(keys)
    w = lambda i, o: jax.random.normal(nk(), (i, o), jnp.float32) * 0.1
    b = lambda o: jax.random.normal(nk(), (o,), jnp.float32) * 0.01

    def s4_layer_params(d):
        return dict(s4_w=w(d, d), s4_b=b(d),
                    w1=w(d, d_ff), b1=b(d_ff),
                    w2=w(d_ff, d), b2=b(d),
                    ln1_g=jnp.ones((d,), jnp.float32),
                    ln1_b=jnp.zeros((d,), jnp.float32),
                    ln2_g=jnp.ones((d,), jnp.float32),
                    ln2_b=jnp.zeros((d,), jnp.float32))

    layers = [s4_layer_params(H)] + [s4_layer_params(d_model)
                                     for _ in range(e_layers - 1)]
    return dict(
        d1w=w(d_var, d_var), d1b=b(d_var),
        d2w=w(d_var, d_var), d2b=b(d_var),
        mem_w=w(d_var, H), mem_b=b(H),
        mt_w=w(d_var, H), mt_b=b(H),
        lin1_w=w(H, d_model), lin1_b=b(d_model),
        norm_g=jnp.ones((d_model,), jnp.float32),
        norm_b=jnp.zeros((d_model,), jnp.float32),
        out_w=w(d_model, d_var), out_b=b(d_var),
        s4_layers=layers,
    )


if __name__ == "__main__":
    cfg = dict(d_var=4, en_conv_hidden_size=8, d_model=32, d_ff=32,
               e_layers=2, dropout=0.1, classification=False)

    B, L = 2, 16
    key = jax.random.PRNGKey(0)
    kp, kx, km, kmax, kmin, kmaxv, kminv = jax.random.split(key, 7)

    params = init_params(kp, cfg)

    seq_x = jax.random.normal(kx, (B, L, cfg["d_var"]), jnp.float32)
    seq_x_mask = (jax.random.uniform(km, (B, L, cfg["d_var"])) > 0.3
                  ).astype(jnp.float32)
    max_idx = jax.random.normal(kmax, (B, L, cfg["d_var"]), jnp.float32)
    min_idx = jax.random.normal(kmin, (B, L, cfg["d_var"]), jnp.float32)
    max_value = jax.random.normal(kmaxv, (B, L, cfg["d_var"]), jnp.float32)
    min_value = jax.random.normal(kminv, (B, L, cfg["d_var"]), jnp.float32)

    out = model_forward(params, cfg, seq_x, seq_x_mask, max_idx, min_idx,
                        max_value, min_value)
    out = jax.block_until_ready(out)
    assert out.shape == (B, L, cfg["d_var"]), out.shape
    assert bool(jnp.all(jnp.isfinite(out)))
    print("KERNEL_OK")
</pallas_src>

<mosaic_0001>
module attributes {stable_mosaic.version = 11 : i64} {
  func.func @kernel(%arg0: memref<6x2x16x4xf32, #tpu.memory_space<vmem>>, %arg1: memref<2x4x16xf32, #tpu.memory_space<vmem>>, %arg2: memref<2x3x32x32xf32, #tpu.memory_space<vmem>>, %arg3: memref<2x7x32xf32, #tpu.memory_space<vmem>>, %arg4: memref<2x32x32xf32, #tpu.memory_space<vmem>>, %arg5: memref<8x32xf32, #tpu.memory_space<vmem>>, %arg6: memref<32x4xf32, #tpu.memory_space<vmem>>) attributes {dimension_semantics = [], scalar_prefetch = 0 : i64, scratch_operands = 0 : i64, tpu.core_type = #tpu.core_type<tc>} {
    %c0 = arith.constant 0 : index
    %c0_0 = arith.constant 0 : index
    %0 = vector.load %arg5[%c0, %c0_0] : memref<8x32xf32, #tpu.memory_space<vmem>>, vector<8x32xf32>
    %1 = vector.extract_strided_slice %0 {offsets = [0, 0], sizes = [1, 4], strides = [1, 1]} : vector<8x32xf32> to vector<1x4xf32>
    %2 = vector.extract_strided_slice %0 {offsets = [1, 0], sizes = [1, 4], strides = [1, 1]} : vector<8x32xf32> to vector<1x4xf32>
    %3 = vector.extract_strided_slice %0 {offsets = [2, 0], sizes = [1, 8], strides = [1, 1]} : vector<8x32xf32> to vector<1x8xf32>
    %4 = vector.extract_strided_slice %0 {offsets = [3, 0], sizes = [1, 8], strides = [1, 1]} : vector<8x32xf32> to vector<1x8xf32>
    %5 = vector.extract_strided_slice %0 {offsets = [4, 0], sizes = [1, 32], strides = [1, 1]} : vector<8x32xf32> to vector<1x32xf32>
    %6 = vector.extract_strided_slice %0 {offsets = [5, 0], sizes = [1, 32], strides = [1, 1]} : vector<8x32xf32> to vector<1x32xf32>
    %7 = vector.extract_strided_slice %0 {offsets = [6, 0], sizes = [1, 32], strides = [1, 1]} : vector<8x32xf32> to vector<1x32xf32>
    %8 = vector.extract_strided_slice %0 {offsets = [7, 0], sizes = [1, 4], strides = [1, 1]} : vector<8x32xf32> to vector<1x4xf32>
    %c0_1 = arith.constant 0 : index
    %c0_2 = arith.constant 0 : index
    %c0_3 = arith.constant 0 : index
    %9 = vector.load %arg1[%c0_1, %c0_2, %c0_3] : memref<2x4x16xf32, #tpu.memory_space<vmem>>, vector<1x4x16xf32>
    %10 = vector.shape_cast %9 : vector<1x4x16xf32> to vector<4x16xf32>
    %11 = vector.extract_strided_slice %10 {offsets = [0, 0], sizes = [4, 8], strides = [1, 1]} : vector<4x16xf32> to vector<4x8xf32>
    %c1 = arith.constant 1 : index
    %c0_4 = arith.constant 0 : index
    %c0_5 = arith.constant 0 : index
    %12 = vector.load %arg1[%c1, %c0_4, %c0_5] : memref<2x4x16xf32, #tpu.memory_space<vmem>>, vector<1x4x16xf32>
    %13 = vector.shape_cast %12 : vector<1x4x16xf32> to vector<4x16xf32>
    %c2 = arith.constant 2 : index
    %c0_6 = arith.constant 0 : index
    %c0_7 = arith.constant 0 : index
    %c0_8 = arith.constant 0 : index
    %14 = vector.load %arg0[%c2, %c0_6, %c0_7, %c0_8] : memref<6x2x16x4xf32, #tpu.memory_space<vmem>>, vector<1x2x16x4xf32>
    %15 = vector.shape_cast %14 : vector<1x2x16x4xf32> to vector<2x16x4xf32>
    %c3 = arith.constant 3 : index
    %c0_9 = arith.constant 0 : index
    %c0_10 = arith.constant 0 : index
    %c0_11 = arith.constant 0 : index
    %16 = vector.load %arg0[%c3, %c0_9, %c0_10, %c0_11] : memref<6x2x16x4xf32, #tpu.memory_space<vmem>>, vector<1x2x16x4xf32>
    %17 = vector.shape_cast %16 : vector<1x2x16x4xf32> to vector<2x16x4xf32>
    %cst = arith.constant dense<0.000000e+00> : vector<2x4xf32>
    %18 = vector.multi_reduction <add>, %15, %cst [1] : vector<2x16x4xf32> to vector<2x4xf32>
    %19 = vector.shape_cast %18 : vector<2x4xf32> to vector<2x1x4xf32>
    %cst_12 = arith.constant 1.600000e+01 : f32
    %20 = vector.broadcast %cst_12 : f32 to vector<2x1x4xf32>
    %21 = arith.divf %19, %20 : vector<2x1x4xf32>
    %22 = vector.broadcast %21 : vector<2x1x4xf32> to vector<2x16x4xf32>
    %23 = arith.subf %15, %22 : vector<2x16x4xf32>
    %24 = arith.mulf %23, %23 : vector<2x16x4xf32>
    %cst_13 = arith.constant dense<0.000000e+00> : vector<2x4xf32>
    %25 = vector.multi_reduction <add>, %24, %cst_13 [1] : vector<2x16x4xf32> to vector<2x4xf32>
    %26 = vector.shape_cast %25 : vector<2x4xf32> to vector<2x1x4xf32>
    %cst_14 = arith.constant 0.0666666701 : f32
    %27 = vector.broadcast %cst_14 : f32 to vector<2x1x4xf32>
    %28 = arith.mulf %26, %27 : vector<2x1x4xf32>
    %29 = math.rsqrt %28 : vector<2x1x4xf32>
    %30 = vector.broadcast %21 : vector<2x1x4xf32> to vector<2x16x4xf32>
    %31 = arith.subf %15, %30 : vector<2x16x4xf32>
    %32 = vector.broadcast %29 : vector<2x1x4xf32> to vector<2x16x4xf32>
    %33 = arith.mulf %31, %32 : vector<2x16x4xf32>
    %cst_15 = arith.constant dense<0.000000e+00> : vector<2x4xf32>
    %34 = vector.multi_reduction <add>, %17, %cst_15 [1] : vector<2x16x4xf32> to vector<2x4xf32>
    %35 = vector.shape_cast %34 : vector<2x4xf32> to vector<2x1x4xf32>
    %cst_16 = arith.constant 1.600000e+01 : f32
    %36 = vector.broadcast %cst_16 : f32 to vector<2x1x4xf32>
    %37 = arith.divf %35, %36 : vector<2x1x4xf32>
    %38 = vector.broadcast %37 : vector<2x1x4xf32> to vector<2x16x4xf32>
    %39 = arith.subf %17, %38 : vector<2x16x4xf32>
    %40 = arith.mulf %39, %39 : vector<2x16x4xf32>
    %cst_17 = arith.constant dense<0.000000e+00> : vector<2x4xf32>
    %41 = vector.multi_reduction <add>, %40, %cst_17 [1] : vector<2x16x4xf32> to vector<2x4xf32>
    %42 = vector.shape_cast %41 : vector<2x4xf32> to vector<2x1x4xf32>
    %cst_18 = arith.constant 0.0666666701 : f32
    %43 = vector.broadcast %cst_18 : f32 to vector<2x1x4xf32>
    %44 = arith.mulf %42, %43 : vector<2x1x4xf32>
    %45 = math.rsqrt %44 : vector<2x1x4xf32>
    %46 = vector.broadcast %37 : vector<2x1x4xf32> to vector<2x16x4xf32>
    %47 = arith.subf %33, %46 : vector<2x16x4xf32>
    %48 = vector.broadcast %45 : vector<2x1x4xf32> to vector<2x16x4xf32>
    %49 = arith.mulf %47, %48 : vector<2x16x4xf32>
    %c0_19 = arith.constant 0 : index
    %c0_20 = arith.constant 0 : index
    %c0_21 = arith.constant 0 : index
    %c0_22 = arith.constant 0 : index
    %50 = vector.load %arg0[%c0_19, %c0_20, %c0_21, %c0_22] : memref<6x2x16x4xf32, #tpu.memory_space<vmem>>, vector<1x2x16x4xf32>
    %51 = vector.shape_cast %50 : vector<1x2x16x4xf32> to vector<2x16x4xf32>
    %52 = vector.shape_cast %51 : vector<2x16x4xf32> to vector<32x4xf32>
    %c1_23 = arith.constant 1 : index
    %c0_24 = arith.constant 0 : index
    %c0_25 = arith.constant 0 : index
    %c0_26 = arith.constant 0 : index
    %53 = vector.load %arg0[%c1_23, %c0_24, %c0_25, %c0_26] : memref<6x2x16x4xf32, #tpu.memory_space<vmem>>, vector<1x2x16x4xf32>
    %54 = vector.shape_cast %53 : vector<1x2x16x4xf32> to vector<2x16x4xf32>
    %55 = vector.shape_cast %54 : vector<2x16x4xf32> to vector<32x4xf32>
    %c4 = arith.constant 4 : index
    %c0_27 = arith.constant 0 : index
    %c0_28 = arith.constant 0 : index
    %c0_29 = arith.constant 0 : index
    %56 = vector.load %arg0[%c4, %c0_27, %c0_28, %c0_29] : memref<6x2x16x4xf32, #tpu.memory_space<vmem>>, vector<1x2x16x4xf32>
    %57 = vector.shape_cast %56 : vector<1x2x16x4xf32> to vector<2x16x4xf32>
    %58 = vector.shape_cast %57 : vector<2x16x4xf32> to vector<32x4xf32>
    %c5 = arith.constant 5 : index
    %c0_30 = arith.constant 0 : index
    %c0_31 = arith.constant 0 : index
    %c0_32 = arith.constant 0 : index
    %59 = vector.load %arg0[%c5, %c0_30, %c0_31, %c0_32] : memref<6x2x16x4xf32, #tpu.memory_space<vmem>>, vector<1x2x16x4xf32>
    %60 = vector.shape_cast %59 : vector<1x2x16x4xf32> to vector<2x16x4xf32>
    %61 = vector.shape_cast %60 : vector<2x16x4xf32> to vector<32x4xf32>
    %62 = vector.shape_cast %33 : vector<2x16x4xf32> to vector<32x4xf32>
    %63 = vector.shape_cast %49 : vector<2x16x4xf32> to vector<32x4xf32>
    %64 = tpu.concatenate %62, %63 in 0 : vector<32x4xf32>, vector<32x4xf32> -> vector<64x4xf32>
    %cst_33 = arith.constant dense<0.000000e+00> : vector<64x8xf32>
    %65 = tpu.matmul %64, %11, %cst_33 {dimension_numbers = #tpu.dot_dimension_numbers<[1], [0], [0], [1], [0, 0, 1, 1], [], []>} : vector<64x4xf32>, vector<4x8xf32>, vector<64x8xf32> -> vector<64x8xf32>
    %66 = vector.extract_strided_slice %65 {offsets = [0, 0], sizes = [32, 4], strides = [1, 1]} : vector<64x8xf32> to vector<32x4xf32>
    %67 = vector.broadcast %1 : vector<1x4xf32> to vector<32x4xf32>
    %68 = arith.addf %66, %67 : vector<32x4xf32>
    %cst_34 = arith.constant 0.000000e+00 : f32
    %69 = vector.broadcast %cst_34 : f32 to vector<32x4xf32>
    %70 = arith.subf %69, %68 : vector<32x4xf32>
    %71 = math.exp %70 : vector<32x4xf32>
    %72 = vector.extract_strided_slice %65 {offsets = [32, 4], sizes = [32, 4], strides = [1, 1]} : vector<64x8xf32> to vector<32x4xf32>
    %73 = vector.broadcast %2 : vector<1x4xf32> to vector<32x4xf32>
    %74 = arith.addf %72, %73 : vector<32x4xf32>
    %cst_35 = arith.constant 0.000000e+00 : f32
    %75 = vector.broadcast %cst_35 : f32 to vector<32x4xf32>
    %76 = arith.subf %75, %74 : vector<32x4xf32>
    %77 = math.exp %76 : vector<32x4xf32>
    %78 = arith.addf %77, %71 : vector<32x4xf32>
    %79 = tpu.reciprocal %78 {approx = true} : vector<32x4xf32> -> vector<32x4xf32>
    %80 = arith.mulf %77, %79 : vector<32x4xf32>
    %81 = arith.mulf %71, %79 : vector<32x4xf32>
    %82 = arith.mulf %80, %58 : vector<32x4xf32>
    %83 = arith.mulf %81, %61 : vector<32x4xf32>
    %84 = arith.addf %82, %83 : vector<32x4xf32>
    %cst_36 = arith.constant 1.000000e+00 : f32
    %85 = vector.broadcast %cst_36 : f32 to vector<32x4xf32>
    %86 = arith.subf %85, %55 : vector<32x4xf32>
    %87 = arith.mulf %84, %86 : vector<32x4xf32>
    %88 = arith.mulf %52, %55 : vector<32x4xf32>
    %89 = arith.addf %87, %88 : vector<32x4xf32>
    %90 = tpu.concatenate %89, %55 in 0 : vector<32x4xf32>, vector<32x4xf32> -> vector<64x4xf32>
    %cst_37 = arith.constant dense<0.000000e+00> : vector<64x16xf32>
    %91 = tpu.matmul %90, %13, %cst_37 {dimension_numbers = #tpu.dot_dimension_numbers<[1], [0], [0], [1], [0, 0, 1, 1], [], []>} : vector<64x4xf32>, vector<4x16xf32>, vector<64x16xf32> -> vector<64x16xf32>
    %92 = vector.extract_strided_slice %91 {offsets = [0, 0], sizes = [32, 8], strides = [1, 1]} : vector<64x16xf32> to vector<32x8xf32>
    %93 = vector.broadcast %3 : vector<1x8xf32> to vector<32x8xf32>
    %94 = arith.addf %92, %93 : vector<32x8xf32>
    %cst_38 = arith.constant 0.000000e+00 : f32
    %95 = vector.broadcast %cst_38 : f32 to vector<32x8xf32>
    %96 = arith.maximumf %94, %95 : vector<32x8xf32>
    %97 = vector.extract_strided_slice %91 {offsets = [32, 8], sizes = [32, 8], strides = [1, 1]} : vector<64x16xf32> to vector<32x8xf32>
    %98 = vector.broadcast %4 : vector<1x8xf32> to vector<32x8xf32>
    %99 = arith.addf %97, %98 : vector<32x8xf32>
    %c0_39 = arith.constant 0 : index
    %c0_40 = arith.constant 0 : index
    %c0_41 = arith.constant 0 : index
    %c0_42 = arith.constant 0 : index
    %100 = vector.load %arg2[%c0_39, %c0_40, %c0_41, %c0_42] : memref<2x3x32x32xf32, #tpu.memory_space<vmem>>, vector<1x3x32x32xf32>
    %101 = vector.shape_cast %100 : vector<1x3x32x32xf32> to vector<3x32x32xf32>
    %c0_43 = arith.constant 0 : index
    %c0_44 = arith.constant 0 : index
    %c0_45 = arith.constant 0 : index
    %102 = vector.load %arg3[%c0_43, %c0_44, %c0_45] : memref<2x7x32xf32, #tpu.memory_space<vmem>>, vector<1x7x32xf32>
    %103 = vector.shape_cast %102 : vector<1x7x32xf32> to vector<7x32xf32>
    %104 = vector.extract_strided_slice %101 {offsets = [0, 0, 0], sizes = [1, 8, 8], strides = [1, 1, 1]} : vector<3x32x32xf32> to vector<1x8x8xf32>
    %105 = vector.shape_cast %104 : vector<1x8x8xf32> to vector<8x8xf32>
    %106 = vector.extract_strided_slice %101 {offsets = [1, 0, 0], sizes = [1, 8, 32], strides = [1, 1, 1]} : vector<3x32x32xf32> to vector<1x8x32xf32>
    %107 = vector.shape_cast %106 : vector<1x8x32xf32> to vector<8x32xf32>
    %108 = vector.extract_strided_slice %101 {offsets = [2, 0, 0], sizes = [1, 32, 8], strides = [1, 1, 1]} : vector<3x32x32xf32> to vector<1x32x8xf32>
    %109 = vector.shape_cast %108 : vector<1x32x8xf32> to vector<32x8xf32>
    %110 = vector.extract_strided_slice %103 {offsets = [0, 0], sizes = [1, 8], strides = [1, 1]} : vector<7x32xf32> to vector<1x8xf32>
    %111 = vector.extract_strided_slice %103 {offsets = [1, 0], sizes = [1, 8], strides = [1, 1]} : vector<7x32xf32> to vector<1x8xf32>
    %112 = vector.extract_strided_slice %103 {offsets = [2, 0], sizes = [1, 8], strides = [1, 1]} : vector<7x32xf32> to vector<1x8xf32>
    %113 = vector.extract_strided_slice %103 {offsets = [3, 0], sizes = [1, 8], strides = [1, 1]} : vector<7x32xf32> to vector<1x8xf32>
    %114 = vector.extract_strided_slice %103 {offsets = [4, 0], sizes = [1, 8], strides = [1, 1]} : vector<7x32xf32> to vector<1x8xf32>
    %115 = vector.extract_strided_slice %103 {offsets = [5, 0], sizes = [1, 8], strides = [1, 1]} : vector<7x32xf32> to vector<1x8xf32>
    %116 = vector.extract_strided_slice %103 {offsets = [6, 0], sizes = [1, 32], strides = [1, 1]} : vector<7x32xf32> to vector<1x32xf32>
    %cst_46 = arith.constant dense<0.000000e+00> : vector<32x8xf32>
    %117 = tpu.matmul %96, %105, %cst_46 {dimension_numbers = #tpu.dot_dimension_numbers<[1], [0], [0], [1], [0, 0, 1, 1], [], []>} : vector<32x8xf32>, vector<8x8xf32>, vector<32x8xf32> -> vector<32x8xf32>
    %118 = vector.broadcast %110 : vector<1x8xf32> to vector<32x8xf32>
    %119 = arith.addf %117, %118 : vector<32x8xf32>
    %120 = math.tanh %119 : vector<32x8xf32>
    %121 = arith.negf %99 : vector<32x8xf32>
    %122 = math.exp %121 : vector<32x8xf32>
    %cst_47 = arith.constant 1.000000e+00 : f32
    %123 = vector.broadcast %cst_47 : f32 to vector<32x8xf32>
    %124 = arith.addf %123, %122 : vector<32x8xf32>
    %125 = arith.divf %123, %124 : vector<32x8xf32>
    %126 = arith.mulf %120, %125 : vector<32x8xf32>
    %127 = arith.addf %96, %126 : vector<32x8xf32>
    %cst_48 = arith.constant dense<0.000000e+00> : vector<32xf32>
    %128 = vector.multi_reduction <add>, %127, %cst_48 [1] : vector<32x8xf32> to vector<32xf32>
    %129 = vector.shape_cast %128 : vector<32xf32> to vector<32x1xf32>
    %cst_49 = arith.constant 8.000000e+00 : f32
    %130 = vector.broadcast %cst_49 : f32 to vector<32x1xf32>
    %131 = arith.divf %129, %130 : vector<32x1xf32>
    %132 = vector.broadcast %131 : vector<32x1xf32> to vector<32x8xf32>
    %133 = arith.subf %127, %132 : vector<32x8xf32>
    %134 = arith.mulf %133, %133 : vector<32x8xf32>
    %cst_50 = arith.constant dense<0.000000e+00> : vector<32xf32>
    %135 = vector.multi_reduction <add>, %134, %cst_50 [1] : vector<32x8xf32> to vector<32xf32>
    %136 = vector.shape_cast %135 : vector<32xf32> to vector<32x1xf32>
    %cst_51 = arith.constant 8.000000e+00 : f32
    %137 = vector.broadcast %cst_51 : f32 to vector<32x1xf32>
    %138 = arith.divf %136, %137 : vector<32x1xf32>
    %139 = vector.broadcast %131 : vector<32x1xf32> to vector<32x8xf32>
    %140 = arith.subf %127, %139 : vector<32x8xf32>
    %cst_52 = arith.constant 9.99999974E-6 : f32
    %141 = vector.broadcast %cst_52 : f32 to vector<32x1xf32>
    %142 = arith.addf %138, %141 : vector<32x1xf32>
    %143 = math.rsqrt %142 : vector<32x1xf32>
    %144 = vector.broadcast %143 : vector<32x1xf32> to vector<32x8xf32>
    %145 = arith.mulf %140, %144 : vector<32x8xf32>
    %146 = vector.broadcast %111 : vector<1x8xf32> to vector<32x8xf32>
    %147 = arith.mulf %145, %146 : vector<32x8xf32>
    %148 = vector.broadcast %112 : vector<1x8xf32> to vector<32x8xf32>
    %149 = arith.addf %147, %148 : vector<32x8xf32>
    %cst_53 = arith.constant dense<0.000000e+00> : vector<32x32xf32>
    %150 = tpu.matmul %149, %107, %cst_53 {dimension_numbers = #tpu.dot_dimension_numbers<[1], [0], [0], [1], [0, 0, 1, 1], [], []>} : vector<32x8xf32>, vector<8x32xf32>, vector<32x32xf32> -> vector<32x32xf32>
    %151 = vector.broadcast %116 : vector<1x32xf32> to vector<32x32xf32>
    %152 = arith.addf %150, %151 : vector<32x32xf32>
    %cst_54 = arith.constant 0.000000e+00 : f32
    %153 = vector.broadcast %cst_54 : f32 to vector<32x32xf32>
    %154 = arith.maximumf %152, %153 : vector<32x32xf32>
    %cst_55 = arith.constant dense<0.000000e+00> : vector<32x8xf32>
    %155 = tpu.matmul %154, %109, %cst_55 {dimension_numbers = #tpu.dot_dimension_numbers<[1], [0], [0], [1], [0, 0, 1, 1], [], []>} : vector<32x32xf32>, vector<32x8xf32>, vector<32x8xf32> -> vector<32x8xf32>
    %156 = vector.broadcast %113 : vector<1x8xf32> to vector<32x8xf32>
    %157 = arith.addf %155, %156 : vector<32x8xf32>
    %158 = arith.addf %149, %157 : vector<32x8xf32>
    %cst_56 = arith.constant dense<0.000000e+00> : vector<32xf32>
    %159 = vector.multi_reduction <add>, %158, %cst_56 [1] : vector<32x8xf32> to vector<32xf32>
    %160 = vector.shape_cast %159 : vector<32xf32> to vector<32x1xf32>
    %cst_57 = arith.constant 8.000000e+00 : f32
    %161 = vector.broadcast %cst_57 : f32 to vector<32x1xf32>
    %162 = arith.divf %160, %161 : vector<32x1xf32>
    %163 = vector.broadcast %162 : vector<32x1xf32> to vector<32x8xf32>
    %164 = arith.subf %158, %163 : vector<32x8xf32>
    %165 = arith.mulf %164, %164 : vector<32x8xf32>
    %cst_58 = arith.constant dense<0.000000e+00> : vector<32xf32>
    %166 = vector.multi_reduction <add>, %165, %cst_58 [1] : vector<32x8xf32> to vector<32xf32>
    %167 = vector.shape_cast %166 : vector<32xf32> to vector<32x1xf32>
    %cst_59 = arith.constant 8.000000e+00 : f32
    %168 = vector.broadcast %cst_59 : f32 to vector<32x1xf32>
    %169 = arith.divf %167, %168 : vector<32x1xf32>
    %170 = vector.broadcast %162 : vector<32x1xf32> to vector<32x8xf32>
    %171 = arith.subf %158, %170 : vector<32x8xf32>
    %cst_60 = arith.constant 9.99999974E-6 : f32
    %172 = vector.broadcast %cst_60 : f32 to vector<32x1xf32>
    %173 = arith.addf %169, %172 : vector<32x1xf32>
    %174 = math.rsqrt %173 : vector<32x1xf32>
    %175 = vector.broadcast %174 : vector<32x1xf32> to vector<32x8xf32>
    %176 = arith.mulf %171, %175 : vector<32x8xf32>
    %177 = vector.broadcast %114 : vector<1x8xf32> to vector<32x8xf32>
    %178 = arith.mulf %176, %177 : vector<32x8xf32>
    %179 = vector.broadcast %115 : vector<1x8xf32> to vector<32x8xf32>
    %180 = arith.addf %178, %179 : vector<32x8xf32>
    %c0_61 = arith.constant 0 : index
    %c0_62 = arith.constant 0 : index
    %c0_63 = arith.constant 0 : index
    %181 = vector.load %arg4[%c0_61, %c0_62, %c0_63] : memref<2x32x32xf32, #tpu.memory_space<vmem>>, vector<1x32x32xf32>
    %182 = vector.shape_cast %181 : vector<1x32x32xf32> to vector<32x32xf32>
    %183 = vector.extract_strided_slice %182 {offsets = [0, 0], sizes = [8, 32], strides = [1, 1]} : vector<32x32xf32> to vector<8x32xf32>
    %cst_64 = arith.constant dense<0.000000e+00> : vector<32x32xf32>
    %184 = tpu.matmul %180, %183, %cst_64 {dimension_numbers = #tpu.dot_dimension_numbers<[1], [0], [0], [1], [0, 0, 1, 1], [], []>} : vector<32x8xf32>, vector<8x32xf32>, vector<32x32xf32> -> vector<32x32xf32>
    %185 = vector.broadcast %5 : vector<1x32xf32> to vector<32x32xf32>
    %186 = arith.addf %184, %185 : vector<32x32xf32>
    %c1_65 = arith.constant 1 : index
    %c0_66 = arith.constant 0 : index
    %c0_67 = arith.constant 0 : index
    %c0_68 = arith.constant 0 : index
    %187 = vector.load %arg2[%c1_65, %c0_66, %c0_67, %c0_68] : memref<2x3x32x32xf32, #tpu.memory_space<vmem>>, vector<1x3x32x32xf32>
    %188 = vector.shape_cast %187 : vector<1x3x32x32xf32> to vector<3x32x32xf32>
    %c1_69 = arith.constant 1 : index
    %c0_70 = arith.constant 0 : index
    %c0_71 = arith.constant 0 : index
    %189 = vector.load %arg3[%c1_69, %c0_70, %c0_71] : memref<2x7x32xf32, #tpu.memory_space<vmem>>, vector<1x7x32xf32>
    %190 = vector.shape_cast %189 : vector<1x7x32xf32> to vector<7x32xf32>
    %191 = vector.extract_strided_slice %188 {offsets = [0, 0, 0], sizes = [1, 32, 32], strides = [1, 1, 1]} : vector<3x32x32xf32> to vector<1x32x32xf32>
    %192 = vector.shape_cast %191 : vector<1x32x32xf32> to vector<32x32xf32>
    %193 = vector.extract_strided_slice %188 {offsets = [1, 0, 0], sizes = [1, 32, 32], strides = [1, 1, 1]} : vector<3x32x32xf32> to vector<1x32x32xf32>
    %194 = vector.shape_cast %193 : vector<1x32x32xf32> to vector<32x32xf32>
    %195 = vector.extract_strided_slice %188 {offsets = [2, 0, 0], sizes = [1, 32, 32], strides = [1, 1, 1]} : vector<3x32x32xf32> to vector<1x32x32xf32>
    %196 = vector.shape_cast %195 : vector<1x32x32xf32> to vector<32x32xf32>
    %197 = vector.extract_strided_slice %190 {offsets = [0, 0], sizes = [1, 32], strides = [1, 1]} : vector<7x32xf32> to vector<1x32xf32>
    %198 = vector.extract_strided_slice %190 {offsets = [1, 0], sizes = [1, 32], strides = [1, 1]} : vector<7x32xf32> to vector<1x32xf32>
    %199 = vector.extract_strided_slice %190 {offsets = [2, 0], sizes = [1, 32], strides = [1, 1]} : vector<7x32xf32> to vector<1x32xf32>
    %200 = vector.extract_strided_slice %190 {offsets = [3, 0], sizes = [1, 32], strides = [1, 1]} : vector<7x32xf32> to vector<1x32xf32>
    %201 = vector.extract_strided_slice %190 {offsets = [4, 0], sizes = [1, 32], strides = [1, 1]} : vector<7x32xf32> to vector<1x32xf32>
    %202 = vector.extract_strided_slice %190 {offsets = [5, 0], sizes = [1, 32], strides = [1, 1]} : vector<7x32xf32> to vector<1x32xf32>
    %203 = vector.extract_strided_slice %190 {offsets = [6, 0], sizes = [1, 32], strides = [1, 1]} : vector<7x32xf32> to vector<1x32xf32>
    %cst_72 = arith.constant dense<0.000000e+00> : vector<32x32xf32>
    %204 = tpu.matmul %186, %192, %cst_72 {dimension_numbers = #tpu.dot_dimension_numbers<[1], [0], [0], [1], [0, 0, 1, 1], [], []>} : vector<32x32xf32>, vector<32x32xf32>, vector<32x32xf32> -> vector<32x32xf32>
    %205 = vector.broadcast %197 : vector<1x32xf32> to vector<32x32xf32>
    %206 = arith.addf %204, %205 : vector<32x32xf32>
    %207 = math.tanh %206 : vector<32x32xf32>
    %208 = arith.addf %186, %207 : vector<32x32xf32>
    %cst_73 = arith.constant dense<0.000000e+00> : vector<32xf32>
    %209 = vector.multi_reduction <add>, %208, %cst_73 [1] : vector<32x32xf32> to vector<32xf32>
    %210 = vector.shape_cast %209 : vector<32xf32> to vector<32x1xf32>
    %cst_74 = arith.constant 3.200000e+01 : f32
    %211 = vector.broadcast %cst_74 : f32 to vector<32x1xf32>
    %212 = arith.divf %210, %211 : vector<32x1xf32>
    %213 = vector.broadcast %212 : vector<32x1xf32> to vector<32x32xf32>
    %214 = arith.subf %208, %213 : vector<32x32xf32>
    %215 = arith.mulf %214, %214 : vector<32x32xf32>
    %cst_75 = arith.constant dense<0.000000e+00> : vector<32xf32>
    %216 = vector.multi_reduction <add>, %215, %cst_75 [1] : vector<32x32xf32> to vector<32xf32>
    %217 = vector.shape_cast %216 : vector<32xf32> to vector<32x1xf32>
    %cst_76 = arith.constant 3.200000e+01 : f32
    %218 = vector.broadcast %cst_76 : f32 to vector<32x1xf32>
    %219 = arith.divf %217, %218 : vector<32x1xf32>
    %220 = vector.broadcast %212 : vector<32x1xf32> to vector<32x32xf32>
    %221 = arith.subf %208, %220 : vector<32x32xf32>
    %cst_77 = arith.constant 9.99999974E-6 : f32
    %222 = vector.broadcast %cst_77 : f32 to vector<32x1xf32>
    %223 = arith.addf %219, %222 : vector<32x1xf32>
    %224 = math.rsqrt %223 : vector<32x1xf32>
    %225 = vector.broadcast %224 : vector<32x1xf32> to vector<32x32xf32>
    %226 = arith.mulf %221, %225 : vector<32x32xf32>
    %227 = vector.broadcast %198 : vector<1x32xf32> to vector<32x32xf32>
    %228 = arith.mulf %226, %227 : vector<32x32xf32>
    %229 = vector.broadcast %199 : vector<1x32xf32> to vector<32x32xf32>
    %230 = arith.addf %228, %229 : vector<32x32xf32>
    %cst_78 = arith.constant dense<0.000000e+00> : vector<32x32xf32>
    %231 = tpu.matmul %230, %194, %cst_78 {dimension_numbers = #tpu.dot_dimension_numbers<[1], [0], [0], [1], [0, 0, 1, 1], [], []>} : vector<32x32xf32>, vector<32x32xf32>, vector<32x32xf32> -> vector<32x32xf32>
    %232 = vector.broadcast %203 : vector<1x32xf32> to vector<32x32xf32>
    %233 = arith.addf %231, %232 : vector<32x32xf32>
    %cst_79 = arith.constant 0.000000e+00 : f32
    %234 = vector.broadcast %cst_79 : f32 to vector<32x32xf32>
    %235 = arith.maximumf %233, %234 : vector<32x32xf32>
    %cst_80 = arith.constant dense<0.000000e+00> : vector<32x32xf32>
    %236 = tpu.matmul %235, %196, %cst_80 {dimension_numbers = #tpu.dot_dimension_numbers<[1], [0], [0], [1], [0, 0, 1, 1], [], []>} : vector<32x32xf32>, vector<32x32xf32>, vector<32x32xf32> -> vector<32x32xf32>
    %237 = vector.broadcast %200 : vector<1x32xf32> to vector<32x32xf32>
    %238 = arith.addf %236, %237 : vector<32x32xf32>
    %239 = arith.addf %230, %238 : vector<32x32xf32>
    %cst_81 = arith.constant dense<0.000000e+00> : vector<32xf32>
    %240 = vector.multi_reduction <add>, %239, %cst_81 [1] : vector<32x32xf32> to vector<32xf32>
    %241 = vector.shape_cast %240 : vector<32xf32> to vector<32x1xf32>
    %cst_82 = arith.constant 3.200000e+01 : f32
    %242 = vector.broadcast %cst_82 : f32 to vector<32x1xf32>
    %243 = arith.divf %241, %242 : vector<32x1xf32>
    %244 = vector.broadcast %243 : vector<32x1xf32> to vector<32x32xf32>
    %245 = arith.subf %239, %244 : vector<32x32xf32>
    %246 = arith.mulf %245, %245 : vector<32x32xf32>
    %cst_83 = arith.constant dense<0.000000e+00> : vector<32xf32>
    %247 = vector.multi_reduction <add>, %246, %cst_83 [1] : vector<32x32xf32> to vector<32xf32>
    %248 = vector.shape_cast %247 : vector<32xf32> to vector<32x1xf32>
    %cst_84 = arith.constant 3.200000e+01 : f32
    %249 = vector.broadcast %cst_84 : f32 to vector<32x1xf32>
    %250 = arith.divf %248, %249 : vector<32x1xf32>
    %251 = vector.broadcast %243 : vector<32x1xf32> to vector<32x32xf32>
    %252 = arith.subf %239, %251 : vector<32x32xf32>
    %cst_85 = arith.constant 9.99999974E-6 : f32
    %253 = vector.broadcast %cst_85 : f32 to vector<32x1xf32>
    %254 = arith.addf %250, %253 : vector<32x1xf32>
    %255 = math.rsqrt %254 : vector<32x1xf32>
    %256 = vector.broadcast %255 : vector<32x1xf32> to vector<32x32xf32>
    %257 = arith.mulf %252, %256 : vector<32x32xf32>
    %258 = vector.broadcast %201 : vector<1x32xf32> to vector<32x32xf32>
    %259 = arith.mulf %257, %258 : vector<32x32xf32>
    %260 = vector.broadcast %202 : vector<1x32xf32> to vector<32x32xf32>
    %261 = arith.addf %259, %260 : vector<32x32xf32>
    %cst_86 = arith.constant dense<0.000000e+00> : vector<32xf32>
    %262 = vector.multi_reduction <add>, %261, %cst_86 [1] : vector<32x32xf32> to vector<32xf32>
    %263 = vector.shape_cast %262 : vector<32xf32> to vector<32x1xf32>
    %cst_87 = arith.constant 3.200000e+01 : f32
    %264 = vector.broadcast %cst_87 : f32 to vector<32x1xf32>
    %265 = arith.divf %263, %264 : vector<32x1xf32>
    %266 = vector.broadcast %265 : vector<32x1xf32> to vector<32x32xf32>
    %267 = arith.subf %261, %266 : vector<32x32xf32>
    %268 = arith.mulf %267, %267 : vector<32x32xf32>
    %cst_88 = arith.constant dense<0.000000e+00> : vector<32xf32>
    %269 = vector.multi_reduction <add>, %268, %cst_88 [1] : vector<32x32xf32> to vector<32xf32>
    %270 = vector.shape_cast %269 : vector<32xf32> to vector<32x1xf32>
    %cst_89 = arith.constant 3.200000e+01 : f32
    %271 = vector.broadcast %cst_89 : f32 to vector<32x1xf32>
    %272 = arith.divf %270, %271 : vector<32x1xf32>
    %273 = vector.broadcast %265 : vector<32x1xf32> to vector<32x32xf32>
    %274 = arith.subf %261, %273 : vector<32x32xf32>
    %cst_90 = arith.constant 9.99999974E-6 : f32
    %275 = vector.broadcast %cst_90 : f32 to vector<32x1xf32>
    %276 = arith.addf %272, %275 : vector<32x1xf32>
    %277 = math.rsqrt %276 : vector<32x1xf32>
    %278 = vector.broadcast %277 : vector<32x1xf32> to vector<32x32xf32>
    %279 = arith.mulf %274, %278 : vector<32x32xf32>
    %280 = vector.broadcast %6 : vector<1x32xf32> to vector<32x32xf32>
    %281 = arith.mulf %279, %280 : vector<32x32xf32>
    %282 = vector.broadcast %7 : vector<1x32xf32> to vector<32x32xf32>
    %283 = arith.addf %281, %282 : vector<32x32xf32>
    %c1_91 = arith.constant 1 : index
    %c0_92 = arith.constant 0 : index
    %c0_93 = arith.constant 0 : index
    %284 = vector.load %arg4[%c1_91, %c0_92, %c0_93] : memref<2x32x32xf32, #tpu.memory_space<vmem>>, vector<1x32x32xf32>
    %285 = vector.shape_cast %284 : vector<1x32x32xf32> to vector<32x32xf32>
    %286 = vector.extract_strided_slice %285 {offsets = [0, 0], sizes = [32, 4], strides = [1, 1]} : vector<32x32xf32> to vector<32x4xf32>
    %cst_94 = arith.constant dense<0.000000e+00> : vector<32x4xf32>
    %287 = tpu.matmul %283, %286, %cst_94 {dimension_numbers = #tpu.dot_dimension_numbers<[1], [0], [0], [1], [0, 0, 1, 1], [], []>} : vector<32x32xf32>, vector<32x4xf32>, vector<32x4xf32> -> vector<32x4xf32>
    %288 = vector.broadcast %8 : vector<1x4xf32> to vector<32x4xf32>
    %289 = arith.addf %287, %288 : vector<32x4xf32>
    %c0_95 = arith.constant 0 : index
    %c0_96 = arith.constant 0 : index
    %290 = vector.load %arg6[%c0_95, %c0_96] : memref<32x4xf32, #tpu.memory_space<vmem>>, vector<32x4xf32>
    tpu.vector_store %arg6[%c0_95, %c0_96], %289 {strides = array<i32>} : memref<32x4xf32, #tpu.memory_space<vmem>>, vector<32x4xf32>,
    return
  }
}

</mosaic_0001>

<bundles_post_ra>
// kernel: tpu_custom_call.1
= control target key start
LH: loop header
LB: loop body
LE: loop exit
PB: predicated region body
PF: predicated region fallthrough
CT: control target
= control target key end

     0   :  { %vm194_vm0 = vcmask 1043456   ;;  %vm37_vm1 = vcmask 31744   ;;  %s2367_s17 = smov 4   ;;  %s2368_s18 = smov 124   ;;  %vm678_vm2 = vcmask 64512   ;;  %vm1006_vm3 = vcmask 261120   ;;  %s2894_s1 = inlined_call_operand.vmem [shape: f32[2,4,16], index: 1, kind: input, shape index: {}]   ;;  %s2895_s0 = inlined_call_operand.vmem [shape: f32[6,2,16,4], index: 0, kind: input, shape index: {}]   ;;  %s2896_s5 = inlined_call_operand.vmem [shape: f32[8,32], index: 5, kind: input, shape index: {}]   ;;  %s2897_s2 = inlined_call_operand.vmem [shape: f32[2,3,32,32], index: 2, kind: input, shape index: {}]   ;;  %s2898_s3 = inlined_call_operand.vmem [shape: f32[2,7,32], index: 3, kind: input, shape index: {}]   ;;  %s2899_s4 = inlined_call_operand.vmem [shape: f32[2,32,32], index: 4, kind: input, shape index: {}]   ;;  %s2900_s6 = inlined_call_operand.vmem [shape: f32[32,4], index: 6, kind: output, shape index: {}]  }
   0x1   :  { %v24_v0 = vld [vmem:[%s2894_s1] sm:$0xf]  ;;  %v1933_v2 = vld [vmem:[%s2895_s0 + $0x48] sm:$0xff]  ;;  %v1934_v7 = vld [vmem:[%s2895_s0 + $0x50] sm:$0xff] }
   0x2   :  { %v1932_v1 = vld [vmem:[%s2895_s0 + $0x40] sm:$0xff]  ;;  %2096 = vmatprep.subr.msk.mxu0 %vm194_vm0, %v24_v0  ;;  %v1937_v4 = vld [vmem:[%s2895_s0 + $0x68] sm:$0xff]  ;;  %v39_v6 = vsel %vm37_vm1, %v1933_v2, 0.0  ;;  %v1935_v11 = vld [vmem:[%s2895_s0 + $0x58] sm:$0xff]  ;;  %v47_v12 = vsel %vm37_vm1, %v1934_v7, 0.0 }
   0x3   :  { %v1936_v3 = vld [vmem:[%s2895_s0 + $0x60] sm:$0xff]  ;;  %v38_v5 = vsel %vm37_vm1, %v1932_v1, 0.0  ;;  %2097 = vmatpush3.msk.msra.mxu0 %vm194_vm0, %v24_v0  ;;  %v94_v10 = vsel %vm37_vm1, %v1937_v4, 0.0  ;;  %v1938_v13 = vld [vmem:[%s2895_s0 + $0x70] sm:$0xff]  ;;  %v1939_v14 = vld [vmem:[%s2895_s0 + $0x78] sm:$0xff]  ;;  %v48_v16 = vsel %vm37_vm1, %v1935_v11, 0.0 }
   0x4   :  { %v40_v8 = vadd.f32 %v39_v6, %v38_v5  ;;  %v93_v9 = vsel %vm37_vm1, %v1936_v3, 0.0  ;;  %v102_v17 = vsel %vm37_vm1, %v1938_v13, 0.0  ;;  %v103_v18 = vsel %vm37_vm1, %v1939_v14, 0.0 }
   0x5   :  { %v95_v15 = vadd.f32 %v94_v10, %v93_v9  ;;  %v49_v20 = vadd.f32 %v48_v16, %v47_v12  ;;  %v104_v21 = vadd.f32 %v103_v18, %v102_v17 }
   0x6   :  { %v41_v19 = vrot.slane %v40_v8, 4 }
   0x7   :  { %v96_v22 = vrot.slane %v95_v15, 4  ;;  %v50_v24 = vrot.slane %v49_v20, 4  ;;  %v105_v25 = vrot.slane %v104_v21, 4 }
   0x8   :  { %v42_v23 = vadd.f32 %v41_v19, %v40_v8 }
   0x9   :  { %v97_v26 = vadd.f32 %v96_v22, %v95_v15  ;;  %v51_v28 = vadd.f32 %v50_v24, %v49_v20  ;;  %v106_v29 = vadd.f32 %v105_v25, %v104_v21 }
   0xa   :  { %v43_v27 = vrot.slane %v42_v23, 2 }
   0xb   :  { %v98_v30 = vrot.slane %v97_v26, 2  ;;  %v52_v32 = vrot.slane %v51_v28, 2  ;;  %v107_v33 = vrot.slane %v106_v29, 2 }
   0xc   :  { %v44_v31 = vadd.f32 %v43_v27, %v42_v23 }
   0xd   :  { %v99_v34 = vadd.f32 %v98_v30, %v97_v26  ;;  %v53_v36 = vadd.f32 %v52_v32, %v51_v28  ;;  %v108_v37 = vadd.f32 %v107_v33, %v106_v29 }
   0xe   :  { %v45_v35 = vrot.slane %v44_v31, 1 }
   0xf   :  { %v100_v38 = vrot.slane %v99_v34, 1  ;;  %v54_v40 = vrot.slane %v53_v36, 1  ;;  %v109_v41 = vrot.slane %v108_v37, 1 }
  0x10   :  { %v46_v39 = vadd.f32 %v45_v35, %v44_v31 }
  0x11   :  { %v101_v42 = vadd.f32 %v100_v38, %v99_v34  ;;  %v55_v44 = vadd.f32 %v54_v40, %v53_v36  ;;  %v110_v45 = vadd.f32 %v109_v41, %v108_v37 }
  0x12   :  { %v57_v43 = vmul.f32 0.0625, %v46_v39 }
  0x13   :  { %v2443_v46 = vmul.f32 0.0625, %v101_v42  ;;  %v58_v49 = vmul.f32 0.0625, %v55_v44  ;;  %v2449_v50 = vmul.f32 0.0625, %v110_v45 }
  0x14   :  { %v2445_v47 = vsub.f32 %v1932_v1, %v57_v43  ;;  %v2447_v48 = vsub.f32 %v1933_v2, %v57_v43 }
  0x15   :  { %v113_v51 = vsub.f32 %v1936_v3, %v2443_v46  ;;  %v114_v52 = vsub.f32 %v1937_v4, %v2443_v46  ;;  %v61_v55 = vsub.f32 %v1934_v7, %v58_v49  ;;  %v62_v56 = vsub.f32 %v1935_v11, %v58_v49 }
  0x16   :  { %v63_v53 = vmul.f32 %v2445_v47, %v2445_v47  ;;  %v64_v54 = vmul.f32 %v2447_v48, %v2447_v48  ;;  %v115_v59 = vsub.f32 %v1938_v13, %v2449_v50  ;;  %v116_v60 = vsub.f32 %v1939_v14, %v2449_v50 }
  0x17   :  { %v117_v57 = vmul.f32 %v113_v51, %v113_v51  ;;  %v118_v58 = vmul.f32 %v114_v52, %v114_v52  ;;  %v65_v63 = vmul.f32 %v61_v55, %v61_v55  ;;  %v66_v0 = vmul.f32 %v62_v56, %v62_v56 }
  0x18   :  { %v67_v61 = vsel %vm37_vm1, %v63_v53, 0.0  ;;  %v68_v62 = vsel %vm37_vm1, %v64_v54, 0.0  ;;  %v119_v4 = vmul.f32 %v115_v59, %v115_v59  ;;  %v120_v8 = vmul.f32 %v116_v60, %v116_v60  ;;  %v2486_v60 = vld [vmem:[%s2896_s5] sm:$0xff] }
  0x19   :  { %v69_v1 = vadd.f32 %v68_v62, %v67_v61  ;;  %v121_v2 = vsel %vm37_vm1, %v117_v57, 0.0  ;;  %v122_v3 = vsel %vm37_vm1, %v118_v58, 0.0  ;;  %v76_v6 = vsel %vm37_vm1, %v65_v63, 0.0 }
  0x1a   :  { %v123_v5 = vadd.f32 %v122_v3, %v121_v2  ;;  %v77_v7 = vsel %vm37_vm1, %v66_v0, 0.0  ;;  %v130_v11 = vsel %vm37_vm1, %v119_v4, 0.0  ;;  %v131_v13 = vsel %vm37_vm1, %v120_v8, 0.0 }
  0x1b   :  { %v70_v9 = vrot.slane %v69_v1, 4  ;;  %v78_v10 = vadd.f32 %v77_v7, %v76_v6  ;;  %v132_v16 = vadd.f32 %v131_v13, %v130_v11 }
  0x1c   :  { %v124_v12 = vrot.slane %v123_v5, 4 }
  0x1d   :  { %v71_v14 = vadd.f32 %v70_v9, %v69_v1  ;;  %v79_v15 = vrot.slane %v78_v10, 4  ;;  %v133_v20 = vrot.slane %v132_v16, 4 }
  0x1e   :  { %v125_v17 = vadd.f32 %v124_v12, %v123_v5 }
  0x1f   :  { %v72_v18 = vrot.slane %v71_v14, 2  ;;  %v80_v19 = vadd.f32 %v79_v15, %v78_v10  ;;  %v134_v24 = vadd.f32 %v133_v20, %v132_v16 }
  0x20   :  { %v126_v21 = vrot.slane %v125_v17, 2 }
  0x21   :  { %v73_v22 = vadd.f32 %v72_v18, %v71_v14  ;;  %v81_v23 = vrot.slane %v80_v19, 2  ;;  %v135_v28 = vrot.slane %v134_v24, 2 }
  0x22   :  { %v127_v25 = vadd.f32 %v126_v21, %v125_v17 }
  0x23   :  { %v74_v26 = vrot.slane %v73_v22, 1  ;;  %v82_v27 = vadd.f32 %v81_v23, %v80_v19  ;;  %v136_v32 = vadd.f32 %v135_v28, %v134_v24 }
  0x24   :  { %v128_v29 = vrot.slane %v127_v25, 1 }
  0x25   :  { %v75_v30 = vadd.f32 %v74_v26, %v73_v22  ;;  %v83_v31 = vrot.slane %v82_v27, 1  ;;  %v137_v36 = vrot.slane %v136_v32, 1 }
  0x26   :  { %v129_v33 = vadd.f32 %v128_v29, %v127_v25 }
  0x27   :  { %v85_v34 = vmul.f32 0.06666667, %v75_v30  ;;  %v84_v35 = vadd.f32 %v83_v31, %v82_v27  ;;  %v138_v39 = vadd.f32 %v137_v36, %v136_v32 }
  0x28   :  { %v139_v37 = vmul.f32 0.06666667, %v129_v33 }
  0x29   :  { %2262 = vrsqrt.f32 %v85_v34  ;;  %v86_v38 = vmul.f32 0.06666667, %v84_v35  ;;  %v140_v40 = vmul.f32 0.06666667, %v138_v39 }
  0x2a   :  { %2264 = vrsqrt.f32 %v139_v37 }
  0x2b   :  { %2266 = vrsqrt.f32 %v86_v38 }
  0x2c   :  { %2268 = vrsqrt.f32 %v140_v40 }
  0x33   :  { %v2263_v41 = vpop.eup %2262 }
  0x34   :  { %v2265_v42 = vpop.eup %2264  ;;  %v89_v43 = vmul.f32 %v2263_v41, %v2445_v47  ;;  %v90_v44 = vmul.f32 %v2263_v41, %v2447_v48 }
  0x35   :  { %v2267_v45 = vpop.eup %2266 }
  0x36   :  { %v143_v49 = vsub.f32 %v89_v43, %v2443_v46  ;;  %2098 = vmatprep.mubr.msk.f32.mxu0 %vm37_vm1, %v89_v43  ;;  %v91_v51 = vmul.f32 %v2267_v45, %v61_v55  ;;  %v92_v52 = vmul.f32 %v2267_v45, %v62_v56  ;;  %v144_v53 = vsub.f32 %v90_v44, %v2443_v46  ;;  %v2269_v58 = vpop.eup %2268 }
  0x37   :  { %2099 = vmatmul.mubr.msk.f32.vlgmr.msra.gmra.mrb[0].mxu0 %vm37_vm1, %v90_v44  ;;  %v303_v46 = vlaneseq }
  0x38   :  { %v147_v54 = vmul.f32 %v2265_v42, %v143_v49  ;;  %2101 = vmatprep.mubr.msk.f32.mxu0 %vm37_vm1, %v91_v51  ;;  %v145_v57 = vsub.f32 %v91_v51, %v2449_v50  ;;  %v148_v47 = vmul.f32 %v2265_v42, %v144_v53  ;;  %v146_v48 = vsub.f32 %v92_v52, %v2449_v50 }
  0x39   :  { %v2481_v56 = vshrl.u32 %v303_v46, 7  ;;  %v2531_v46 = vld [vmem:[%s2895_s0 + $0x20] sm:$0xff] }
  0x3a   :  { %v149_v59 = vmul.f32 %v2269_v58, %v145_v57  ;;  %v150_v55 = vmul.f32 %v2269_v58, %v146_v48 }
  0x3b   :  { %2102 = vmatmul.mubr.msk.f32.gmra.mrb[2].mxu0 %vm37_vm1, %v92_v52  ;;  %v2489_v50 = vsub.s32 1, %v2481_v56  ;;  %v2495_v62 = vsub.s32 0, %v2481_v56 }
  0x3c   :  { %2104 = vmatprep.mubr.msk.f32.mxu0 %vm37_vm1, %v147_v54 }
  0x3d   :  { %v326_v61 = vrot.slane %v2486_v60, %v2489_v50  ;;  %v306_v63 = vrot.slane %v2486_v60, %v2495_v62 }
  0x3f   :  { %2105 = vmatmul.mubr.msk.f32.gmra.mrb[4].mxu0 %vm37_vm1, %v148_v47  ;;  %328 = vrot.lane.b32.xlu0 %v326_v61, %s2367_s17 }
  0x40   :  { %2107 = vmatprep.mubr.msk.f32.mxu0 %vm37_vm1, %v149_v59 }
  0x43   :  { %2108 = vmatmul.mubr.msk.f32.gmra.mrb[6].mxu0 %vm37_vm1, %v150_v55  ;;  %v1945_v55 = vld [vmem:[%s2895_s0 + $0x88] sm:$0xff] }
  0xb1   :  { %v329_v24 = vpop.permute.xlu0 %328 }
 0x10a   :  { %v2100_v0 = vpop.f32.mrb[0].mxu0 }
 0x10b   :  { %v308_v1 = vadd.f32 %v2100_v0, %v306_v63  ;;  %v264_v2 = vpop.f32.mrb[1].mxu0  ;;  %v439_v0 = vsub.f32 1.0, %v2531_v46 }
 0x10c   :  { %v307_v3 = vadd.f32 %v306_v63, %v264_v2  ;;  %v1946_v2 = vld [vmem:[%s2895_s0 + $0x90] sm:$0xff] }
 0x10d   :  { %v312_v4 = vsub.f32 0.0, %v308_v1  ;;  %v2544_v1 = vld [vmem:[%s2895_s0 + $0x28] sm:$0xff] }
 0x10e   :  { %v311_v5 = vsub.f32 0.0, %v307_v3  ;;  %v2103_v6 = vpop.f32.mrb[2].mxu0  ;;  %v440_v3 = vsub.f32 1.0, %v2544_v1 }
 0x10f   :  { %v317_v7 = vmul.f32 1.442695, %v312_v4  ;;  %v310_v8 = vadd.f32 %v2103_v6, %v306_v63  ;;  %v274_v9 = vpop.f32.mrb[3].mxu0  ;;  %v151_v4 = vld [vmem:[%s2895_s0] sm:$0xff]  ;;  %v2561_v6 = vld [vmem:[%s2895_s0 + $0x30] sm:$0xff] }
 0x110   :  { %v315_v10 = vmul.f32 1.442695, %v311_v5  ;;  %v309_v11 = vadd.f32 %v306_v63, %v274_v9  ;;  %v1944_v63 = vld [vmem:[%s2895_s0 + $0x80] sm:$0xff]  ;;  %v1947_v5 = vld [vmem:[%s2895_s0 + $0x98] sm:$0xff]  ;;  %v441_v9 = vsub.f32 1.0, %v2561_v6 }
 0x111   :  { %2270 = vpow2.f32 %v317_v7  ;;  %v314_v12 = vsub.f32 0.0, %v310_v8  ;;  %v463_v7 = vmul.f32 %v2531_v46, %v151_v4  ;;  %v152_v8 = vld [vmem:[%s2895_s0 + $0x8] sm:$0xff] }
 0x112   :  { %2272 = vpow2.f32 %v315_v10  ;;  %v313_v13 = vsub.f32 0.0, %v309_v11  ;;  %v2106_v14 = vpop.f32.mrb[4].mxu0  ;;  %v464_v10 = vmul.f32 %v2544_v1, %v152_v8  ;;  %v1949_v11 = vld [vmem:[%s2895_s0 + $0xa8] sm:$0xff] }
 0x113   :  { %v321_v15 = vmul.f32 1.442695, %v314_v12  ;;  %v284_v16 = vpop.f32.mrb[5].mxu0  ;;  %v332_v25 = vadd.f32 %v2106_v14, %v329_v24  ;;  %v1948_v14 = vld [vmem:[%s2895_s0 + $0xa0] sm:$0xff] }
 0x114   :  { %v319_v17 = vmul.f32 1.442695, %v313_v13  ;;  %v331_v26 = vadd.f32 %v329_v24, %v284_v16 }
 0x115   :  { %2274 = vpow2.f32 %v321_v15  ;;  %v336_v27 = vsub.f32 0.0, %v332_v25 }
 0x116   :  { %2276 = vpow2.f32 %v319_v17  ;;  %v2109_v18 = vpop.f32.mrb[6].mxu0  ;;  %v335_v28 = vsub.f32 0.0, %v331_v26  ;;  %v2585_v17 = vld [vmem:[%s2895_s0 + $0x38] sm:$0xff] }
 0x117   :  { %v294_v19 = vpop.f32.mrb[7].mxu0  ;;  %v334_v29 = vadd.f32 %v2109_v18, %v329_v24  ;;  %v341_v31 = vmul.f32 1.442695, %v336_v27  ;;  %v442_v25 = vsub.f32 1.0, %v2585_v17 }
 0x118   :  { %v333_v30 = vadd.f32 %v329_v24, %v294_v19  ;;  %v339_v32 = vmul.f32 1.442695, %v335_v28 }
 0x119   :  { %v338_v33 = vsub.f32 0.0, %v334_v29  ;;  %2278 = vpow2.f32 %v341_v31 }
 0x11a   :  { %v337_v34 = vsub.f32 0.0, %v333_v30  ;;  %2280 = vpow2.f32 %v339_v32  ;;  %v1950_v30 = vld [vmem:[%s2895_s0 + $0xb0] sm:$0xff] }
 0x11b   :  { %v2499_v20 = vpop.eup %2270  ;;  %v345_v35 = vmul.f32 1.442695, %v338_v33 }
 0x11c   :  { %v2501_v21 = vpop.eup %2272  ;;  %353 = vrot.lane.b32.xlu1 %v2499_v20, %s2367_s17  ;;  %v343_v36 = vmul.f32 1.442695, %v337_v34 }
 0x11d   :  { %351 = vrot.lane.b32.xlu0 %v2501_v21, %s2367_s17  ;;  %2282 = vpow2.f32 %v345_v35 }
 0x11e   :  { %2284 = vpow2.f32 %v343_v36 }
 0x11f   :  { %v2507_v22 = vpop.eup %2274 }
 0x120   :  { %v2509_v23 = vpop.eup %2276 }
 0x121   :  { %357 = vrot.lane.b32.xlu0 %v2507_v22, %s2367_s17  ;;  %355 = vrot.lane.b32.xlu1 %v2509_v23, %s2367_s17 }
 0x123   :  { %v2279_v37 = vpop.eup %2278 }
 0x124   :  { %v2281_v38 = vpop.eup %2280 }
 0x127   :  { %v2283_v43 = vpop.eup %2282 }
 0x128   :  { %v2285_v44 = vpop.eup %2284 }
 0x18e   :  { %v354_v39 = vpop.permute.xlu1 %353 }
 0x18f   :  { %v364_v40 = vadd.f32 %v2279_v37, %v354_v39  ;;  %v352_v41 = vpop.permute.xlu0 %351 }
 0x190   :  { %v363_v42 = vadd.f32 %v2281_v38, %v352_v41 }
 0x191   :  { %2286 = vrcp.f32 %v364_v40  ;;  %v1931_v40 = vld [vmem:[%s2894_s1 + $0x4] sm:$0xf] }
 0x192   :  { %2288 = vrcp.f32 %v363_v42  ;;  %2110 = vmatprep.subr.msk.mxu1 %vm194_vm0, %v1931_v40 }
 0x193   :  { %v358_v45 = vpop.permute.xlu0 %357  ;;  %v356_v49 = vpop.permute.xlu1 %355  ;;  %2111 = vmatpush3.msk.msra.mxu1 %vm194_vm0, %v1931_v40 }
 0x194   :  { %v366_v51 = vadd.f32 %v2283_v43, %v358_v45  ;;  %v365_v52 = vadd.f32 %v2285_v44, %v356_v49 }
 0x196   :  { %2290 = vrcp.f32 %v366_v51 }
 0x197   :  { %2292 = vrcp.f32 %v365_v52 }
 0x19b   :  { %v2287_v53 = vpop.eup %2286 }
 0x19c   :  { %v2289_v54 = vpop.eup %2288  ;;  %381 = vrot.lane.b32.xlu0 %v2287_v53, %s2368_s18  ;;  %v2516_v57 = vmul.f32 %v2287_v53, %v2279_v37 }
 0x19d   :  { %379 = vrot.lane.b32.xlu1 %v2289_v54, %s2368_s18  ;;  %v2519_v58 = vmul.f32 %v2289_v54, %v2281_v38 }
 0x1a0   :  { %v2291_v47 = vpop.eup %2290 }
 0x1a1   :  { %v2293_v48 = vpop.eup %2292  ;;  %385 = vrot.lane.b32.xlu0 %v2291_v47, %s2368_s18  ;;  %v2522_v59 = vmul.f32 %v2291_v47, %v2283_v43 }
 0x1a2   :  { %383 = vrot.lane.b32.xlu1 %v2293_v48, %s2368_s18  ;;  %v2533_v61 = vmul.f32 %v2293_v48, %v2285_v44 }
 0x1a5   :  { %401 = vrot.lane.b32.xlu0 %v1945_v55, %s2367_s17 }
 0x1a6   :  { %399 = vrot.lane.b32.xlu1 %v1944_v63, %s2367_s17 }
 0x1a9   :  { %447 = vrot.lane.b32.xlu0 %v439_v0, %s2367_s17 }
 0x1aa   :  { %403 = vrot.lane.b32.xlu1 %v1946_v2, %s2367_s17 }
 0x1ad   :  { %449 = vrot.lane.b32.xlu0 %v440_v3, %s2367_s17 }
 0x1ae   :  { %405 = vrot.lane.b32.xlu1 %v1947_v5, %s2367_s17 }
 0x1b1   :  { %471 = vrot.lane.b32.xlu0 %v463_v7, %s2367_s17 }
 0x1b2   :  { %451 = vrot.lane.b32.xlu1 %v441_v9, %s2367_s17 }
 0x1b5   :  { %473 = vrot.lane.b32.xlu0 %v464_v10, %s2367_s17 }
 0x20e   :  { %v382_v12 = vpop.permute.xlu0 %381 }
 0x20f   :  { %v392_v13 = vmul.f32 %v2499_v20, %v382_v12  ;;  %v380_v15 = vpop.permute.xlu1 %379  ;;  %v1951_v20 = vld [vmem:[%s2895_s0 + $0xb8] sm:$0xff] }
 0x210   :  { %v391_v16 = vmul.f32 %v2501_v21, %v380_v15  ;;  %v154_v21 = vld [vmem:[%s2895_s0 + $0x18] sm:$0xff]  ;;  %v2644_v15 = vsub.s32 3, %v2481_v56 }
 0x211   :  { %v416_v18 = vmul.f32 %v1949_v11, %v392_v13  ;;  %v466_v31 = vmul.f32 %v2585_v17, %v154_v21 }
 0x212   :  { %v415_v19 = vmul.f32 %v1948_v14, %v391_v16  ;;  %v667_v14 = vld [vmem:[%s2897_s2] sm:$0xff]  ;;  %v658_v16 = vrot.slane %v2486_v60, %v2644_v15 }
 0x213   :  { %425 = vrot.lane.b32.xlu0 %v416_v18, %s2367_s17  ;;  %v386_v24 = vpop.permute.xlu0 %385  ;;  %2124 = vmatprep.subr.mxu0 %v667_v14 }
 0x214   :  { %v394_v26 = vmul.f32 %v2507_v22, %v386_v24  ;;  %v384_v27 = vpop.permute.xlu1 %383  ;;  %423 = vrot.lane.b32.xlu1 %v415_v19, %s2367_s17  ;;  %v153_v22 = vld [vmem:[%s2895_s0 + $0x10] sm:$0xff]  ;;  %2125 = vmatpush3.msra.mxu0 %v667_v14  ;;  %v2653_v24 = vsub.s32 2, %v2481_v56 }
 0x215   :  { %v393_v29 = vmul.f32 %v2509_v23, %v384_v27  ;;  %v465_v23 = vmul.f32 %v2561_v6, %v153_v22 }
 0x216   :  { %v418_v28 = vmul.f32 %v1951_v20, %v394_v26 }
 0x217   :  { %453 = vrot.lane.b32.xlu0 %v442_v25, %s2367_s17  ;;  %v417_v32 = vmul.f32 %v1950_v30, %v393_v29  ;;  %v402_v33 = vpop.permute.xlu0 %401  ;;  %v646_v25 = vrot.slane %v2486_v60, %v2653_v24 }
 0x218   :  { %429 = vrot.lane.b32.xlu1 %v418_v28, %s2367_s17  ;;  %v400_v35 = vpop.permute.xlu1 %399  ;;  %v412_v43 = vmul.f32 %v402_v33, %v2516_v57 }
 0x219   :  { %v411_v44 = vmul.f32 %v400_v35, %v2519_v58 }
 0x21b   :  { %477 = vrot.lane.b32.xlu0 %v466_v31, %s2367_s17  ;;  %v448_v34 = vpop.permute.xlu0 %447 }
 0x21c   :  { %427 = vrot.lane.b32.xlu1 %v417_v32, %s2367_s17  ;;  %v404_v37 = vpop.permute.xlu1 %403 }
 0x21d   :  { %v413_v3 = vmul.f32 %v404_v37, %v2533_v61 }
 0x21f   :  { %v450_v36 = vpop.permute.xlu0 %449 }
 0x220   :  { %475 = vrot.lane.b32.xlu1 %v465_v23, %s2367_s17  ;;  %v406_v39 = vpop.permute.xlu1 %405 }
 0x221   :  { %v414_v54 = vmul.f32 %v406_v39, %v2522_v59 }
 0x223   :  { %v472_v38 = vpop.permute.xlu0 %471 }
 0x224   :  { %v452_v42 = vpop.permute.xlu1 %451 }
 0x227   :  { %v474_v41 = vpop.permute.xlu0 %473 }
 0x285   :  { %v426_v45 = vpop.permute.xlu0 %425 }
 0x286   :  { %v436_v49 = vadd.f32 %v426_v45, %v412_v43  ;;  %v424_v51 = vpop.permute.xlu1 %423 }
 0x287   :  { %v435_v52 = vadd.f32 %v424_v51, %v411_v44 }
 0x288   :  { %v460_v53 = vmul.f32 %v450_v36, %v436_v49 }
 0x289   :  { %v459_v47 = vmul.f32 %v448_v34, %v435_v52  ;;  %v454_v48 = vpop.permute.xlu0 %453 }
 0x28a   :  { %v430_v55 = vpop.permute.xlu1 %429  ;;  %v484_v63 = vadd.f32 %v474_v41, %v460_v53 }
 0x28b   :  { %v438_v0 = vadd.f32 %v430_v55, %v414_v54  ;;  %v483_v2 = vadd.f32 %v472_v38, %v459_v47 }
 0x28c   :  { %505 = vrot.lane.b32.xlu0 %v484_v63, %s2368_s18 }
 0x28d   :  { %503 = vrot.lane.b32.xlu1 %v483_v2, %s2368_s18  ;;  %v478_v57 = vpop.permute.xlu0 %477  ;;  %v462_v58 = vmul.f32 %v454_v48, %v438_v0 }
 0x28e   :  { %v428_v4 = vpop.permute.xlu1 %427 }
 0x28f   :  { %v486_v5 = vadd.f32 %v478_v57, %v462_v58  ;;  %v437_v7 = vadd.f32 %v428_v4, %v413_v3 }
 0x291   :  { %509 = vrot.lane.b32.xlu0 %v486_v5, %s2368_s18  ;;  %v461_v59 = vmul.f32 %v452_v42, %v437_v7 }
 0x292   :  { %v476_v8 = vpop.permute.xlu1 %475 }
 0x293   :  { %v485_v9 = vadd.f32 %v476_v8, %v461_v59  ;;  %v2684_v8 = vld [vmem:[%s2898_s3] sm:$0x7f] }
 0x295   :  { %507 = vrot.lane.b32.xlu1 %v485_v9, %s2368_s18  ;;  %493 = vrot.lane.b32.xlu0 %v2544_v1, %s2367_s17  ;;  %v677_v9 = vrot.slane %v2684_v8, %v2495_v62 }
 0x299   :  { %491 = vrot.lane.b32.xlu1 %v2531_v46, %s2367_s17  ;;  %497 = vrot.lane.b32.xlu0 %v2585_v17, %s2367_s17 }
 0x29d   :  { %495 = vrot.lane.b32.xlu1 %v2561_v6, %s2367_s17  ;;  %s2369_s17 = smov 8  }
 0x2fe   :  { %v506_v61 = vpop.permute.xlu0 %505 }
 0x2ff   :  { %v504_v10 = vpop.permute.xlu1 %503 }
 0x300   :  { %2112 = vmatprep.mubr.msk.f32.mxu1 %vm37_vm1, %v504_v10 }
 0x301   :  { %2113 = vmatmul.mubr.msk.f32.vlgmr.msra.gmra.mrb[0].mxu1 %vm37_vm1, %v506_v61 }
 0x303   :  { %v510_v11 = vpop.permute.xlu0 %509 }
 0x307   :  { %v508_v12 = vpop.permute.xlu1 %507  ;;  %v494_v13 = vpop.permute.xlu0 %493 }
 0x308   :  { %2115 = vmatprep.mubr.msk.f32.mxu1 %vm37_vm1, %v508_v12  ;;  %513 = vrot.lane.b32.xlu0 %v494_v13, %s2368_s18 }
 0x309   :  { %2116 = vmatmul.mubr.msk.f32.gmra.mrb[2].mxu1 %vm37_vm1, %v510_v11 }
 0x30b   :  { %v492_v46 = vpop.permute.xlu1 %491  ;;  %v498_v1 = vpop.permute.xlu0 %497 }
 0x30c   :  { %511 = vrot.lane.b32.xlu1 %v492_v46, %s2368_s18  ;;  %517 = vrot.lane.b32.xlu0 %v498_v1, %s2368_s18 }
 0x30f   :  { %v496_v6 = vpop.permute.xlu1 %495 }
 0x310   :  { %515 = vrot.lane.b32.xlu1 %v496_v6, %s2368_s18  ;;  %s2370_s18 = smov 120  }
 0x314   :  { %660 = vrot.lane.b32.xlu1 %v658_v16, %s2369_s17 }
 0x37a   :  { %v514_v17 = vpop.permute.xlu0 %513 }
 0x37e   :  { %v512_v18 = vpop.permute.xlu1 %511  ;;  %v518_v19 = vpop.permute.xlu0 %517 }
 0x37f   :  { %2118 = vmatprep.mubr.msk.f32.mxu1 %vm37_vm1, %v512_v18 }
 0x380   :  { %2119 = vmatmul.mubr.msk.f32.gmra.mrb[4].mxu1 %vm37_vm1, %v514_v17 }
 0x382   :  { %v516_v20 = vpop.permute.xlu1 %515 }
 0x383   :  { %2121 = vmatprep.mubr.msk.f32.mxu1 %vm37_vm1, %v516_v20 }
 0x384   :  { %2122 = vmatmul.mubr.msk.f32.gmra.mrb[6].mxu1 %vm37_vm1, %v518_v19 }
 0x386   :  { %v661_v35 = vpop.permute.xlu1 %660 }
 0x3d4   :  { %v2114_v26 = vpop.f32.mrb[0].mxu1 }
 0x3d5   :  { %v2657_v27 = vadd.f32 %v2114_v26, %v646_v25  ;;  %v604_v21 = vpop.f32.mrb[1].mxu1 }
 0x3d6   :  { %v2659_v28 = vadd.f32 %v646_v25, %v604_v21 }
 0x3d7   :  { %v652_v30 = vmax.f32 %v2657_v27, 0.0 }
 0x3d8   :  { %v651_v29 = vmax.f32 %v2659_v28, 0.0 }
 0x3da   :  { %2126 = vmatprep.mubr.msk.f32.mxu0 %vm678_vm2, %v651_v29 }
 0x3db   :  { %2127 = vmatmul.mubr.msk.f32.vlgmr.msra.gmra.mrb[8].mxu0 %vm678_vm2, %v652_v30 }
 0x3dc   :  { %v2117_v31 = vpop.f32.mrb[2].mxu1 }
 0x3dd   :  { %v2669_v22 = vadd.f32 %v2117_v31, %v646_v25  ;;  %v614_v32 = vpop.f32.mrb[3].mxu1 }
 0x3de   :  { %v2671_v23 = vadd.f32 %v646_v25, %v614_v32 }
 0x3df   :  { %v654_v34 = vmax.f32 %v2669_v22, 0.0 }
 0x3e0   :  { %v653_v33 = vmax.f32 %v2671_v23, 0.0 }
 0x3e2   :  { %2129 = vmatprep.mubr.msk.f32.mxu0 %vm678_vm2, %v653_v33 }
 0x3e3   :  { %2130 = vmatmul.mubr.msk.f32.gmra.mrb[10].mxu0 %vm678_vm2, %v654_v34 }
 0x453   :  { %v2120_v36 = vpop.f32.mrb[4].mxu1 }
 0x454   :  { %v664_v37 = vadd.f32 %v2120_v36, %v661_v35  ;;  %v624_v38 = vpop.f32.mrb[5].mxu1 }
 0x455   :  { %v663_v39 = vadd.f32 %v661_v35, %v624_v38 }
 0x456   :  { %v1975_v40 = vmul.f32 -1.442695, %v664_v37 }
 0x457   :  { %v1974_v41 = vmul.f32 -1.442695, %v663_v39  ;;  %v2123_v42 = vpop.f32.mrb[6].mxu1 }
 0x458   :  { %2294 = vpow2.f32 %v1975_v40  ;;  %v666_v43 = vadd.f32 %v2123_v42, %v661_v35  ;;  %v634_v44 = vpop.f32.mrb[7].mxu1 }
 0x459   :  { %2296 = vpow2.f32 %v1974_v41  ;;  %v665_v45 = vadd.f32 %v661_v35, %v634_v44 }
 0x45a   :  { %v1977_v49 = vmul.f32 -1.442695, %v666_v43 }
 0x45b   :  { %v1976_v51 = vmul.f32 -1.442695, %v665_v45 }
 0x45c   :  { %2298 = vpow2.f32 %v1977_v49 }
 0x45d   :  { %2300 = vpow2.f32 %v1976_v51 }
 0x462   :  { %v2295_v52 = vpop.eup %2294 }
 0x463   :  { %v2297_v53 = vpop.eup %2296  ;;  %v793_v54 = vadd.f32 1.0, %v2295_v52 }
 0x464   :  { %v792_v47 = vadd.f32 1.0, %v2297_v53 }
 0x465   :  { %2302 = vrcp.f32 %v793_v54 }
 0x466   :  { %v2299_v48 = vpop.eup %2298  ;;  %2304 = vrcp.f32 %v792_v47 }
 0x467   :  { %v2301_v55 = vpop.eup %2300  ;;  %v795_v63 = vadd.f32 1.0, %v2299_v48  ;;  %v668_v48 = vld [vmem:[%s2897_s2 + $0x20] sm:$0xff] }
 0x468   :  { %v794_v0 = vadd.f32 1.0, %v2301_v55  ;;  %2132 = vmatprep.subr.mxu1 %v668_v48  ;;  %v669_v55 = vld [vmem:[%s2897_s2 + $0x40] sm:$0xff] }
 0x469   :  { %2306 = vrcp.f32 %v795_v63  ;;  %2133 = vmatpush3.msra.mxu1 %v668_v48  ;;  %v670_v63 = vld [vmem:[%s2897_s2 + $0x48] sm:$0xff] }
 0x46a   :  { %2308 = vrcp.f32 %v794_v0  ;;  %v2218_v0 = vpack.c.bf16 %v670_v63, %v669_v55 }
 0x46c   :  { %2219 = vmatprep.subr.bf16.mxu0 %v2218_v0 }
 0x46d   :  { %2221 = vmatpush3.bf16.msra.mxu0 %v2218_v0 }
 0x46f   :  { %v2303_v2 = vpop.eup %2302 }
 0x470   :  { %v2305_v3 = vpop.eup %2304  ;;  %810 = vrot.lane.b32.xlu1 %v2303_v2, %s2370_s18 }
 0x471   :  { %808 = vrot.lane.b32.xlu0 %v2305_v3, %s2370_s18 }
 0x473   :  { %v2307_v57 = vpop.eup %2306 }
 0x474   :  { %v2309_v58 = vpop.eup %2308  ;;  %814 = vrot.lane.b32.xlu1 %v2307_v57, %s2370_s18 }
 0x475   :  { %812 = vrot.lane.b32.xlu0 %v2309_v58, %s2370_s18 }
 0x4ae   :  { %v2128_v4 = vpop.f32.mrb[8].mxu0 }
 0x4af   :  { %v757_v5 = vpop.f32.mrb[9].mxu0  ;;  %v763_v61 = vadd.f32 %v2128_v4, %v677_v9 }
 0x4b0   :  { %v758_v10 = vadd.f32 %v757_v5, %v677_v9 }
 0x4b1   :  { %2310 = vtanh.f32 %v763_v61 }
 0x4b2   :  { %2312 = vtanh.f32 %v758_v10 }
 0x4b6   :  { %v2131_v7 = vpop.f32.mrb[10].mxu0 }
 0x4b7   :  { %v767_v59 = vpop.f32.mrb[11].mxu0  ;;  %v773_v11 = vadd.f32 %v2131_v7, %v677_v9 }
 0x4b8   :  { %v768_v12 = vadd.f32 %v767_v59, %v677_v9 }
 0x4b9   :  { %2314 = vtanh.f32 %v773_v11 }
 0x4ba   :  { %2316 = vtanh.f32 %v768_v12  ;;  %v884_v12 = vrot.slane %v2684_v8, %v2489_v50 }
 0x4bb   :  { %v2311_v13 = vpop.eup %2310 }
 0x4bc   :  { %v2313_v1 = vpop.eup %2312 }
 0x4c3   :  { %v2315_v18 = vpop.eup %2314 }
 0x4c4   :  { %v2317_v25 = vpop.eup %2316 }
 0x4e2   :  { %v811_v46 = vpop.permute.xlu1 %810 }
 0x4e3   :  { %v821_v6 = vmul.f32 %v2311_v13, %v811_v46  ;;  %v809_v14 = vpop.permute.xlu0 %808 }
 0x4e4   :  { %v820_v16 = vmul.f32 %v2313_v1, %v809_v14  ;;  %v892_v14 = vrot.slane %v2684_v8, %v2653_v24 }
 0x4e5   :  { %v825_v17 = vadd.f32 %v821_v6, %v652_v30 }
 0x4e6   :  { %v815_v19 = vpop.permute.xlu1 %814  ;;  %v824_v20 = vadd.f32 %v820_v16, %v651_v29 }
 0x4e7   :  { %v813_v26 = vpop.permute.xlu0 %812  ;;  %v831_v21 = vsel %vm678_vm2, %v825_v17, 0.0  ;;  %v823_v31 = vmul.f32 %v2315_v18, %v815_v19 }
 0x4e8   :  { %v822_v32 = vmul.f32 %v2317_v25, %v813_v26  ;;  %832 = vadd.xlane.f32.xlu1 %v831_v21  ;;  %v828_v35 = vsel %vm678_vm2, %v824_v20, 0.0 }
 0x4e9   :  { %829 = vadd.xlane.f32.xlu0 %v828_v35  ;;  %v827_v30 = vadd.f32 %v823_v31, %v654_v34 }
 0x4ea   :  { %v826_v36 = vadd.f32 %v822_v32, %v653_v33 }
 0x4eb   :  { %v837_v28 = vsel %vm678_vm2, %v827_v30, 0.0 }
 0x4ec   :  { %v834_v27 = vsel %vm678_vm2, %v826_v36, 0.0 }
 0x4ed   :  { %835 = vadd.xlane.f32.xlu0 %v834_v27  ;;  %v671_v27 = vld [vmem:[%s2897_s2 + $0x50] sm:$0xff] }
 0x4f1   :  { %838 = vadd.xlane.f32.xlu0 %v837_v28 }
 0x575   :  { %v833_v29 = vpop.xlane.xlu1 %832 }
 0x576   :  { %v842_v37 = vmul.f32 0.125, %v833_v29  ;;  %v830_v38 = vpop.xlane.xlu0 %829  ;;  %v2728_v29 = vsub.s32 6, %v2481_v56 }
 0x577   :  { %v841_v39 = vmul.f32 0.125, %v830_v38 }
 0x578   :  { %v846_v40 = vsub.f32 %v825_v17, %v842_v37  ;;  %v900_v37 = vrot.slane %v2684_v8, %v2728_v29 }
 0x579   :  { %v845_v41 = vsub.f32 %v824_v20, %v841_v39 }
 0x57a   :  { %v836_v42 = vpop.xlane.xlu0 %835  ;;  %v850_v43 = vmul.f32 %v846_v40, %v846_v40 }
 0x57b   :  { %v843_v44 = vmul.f32 0.125, %v836_v42  ;;  %v849_v23 = vmul.f32 %v845_v41, %v845_v41 }
 0x57c   :  { %v856_v33 = vsel %vm678_vm2, %v850_v43, 0.0 }
 0x57d   :  { %v847_v45 = vsub.f32 %v826_v36, %v843_v44  ;;  %857 = vadd.xlane.f32.xlu0 %v856_v33  ;;  %v853_v22 = vsel %vm678_vm2, %v849_v23, 0.0 }
 0x57e   :  { %854 = vadd.xlane.f32.xlu1 %v853_v22  ;;  %v839_v34 = vpop.xlane.xlu0 %838 }
 0x57f   :  { %v844_v49 = vmul.f32 0.125, %v839_v34  ;;  %v851_v51 = vmul.f32 %v847_v45, %v847_v45 }
 0x581   :  { %v848_v52 = vsub.f32 %v827_v30, %v844_v49  ;;  %v859_v53 = vsel %vm678_vm2, %v851_v51, 0.0  ;;  %v672_v30 = vld [vmem:[%s2897_s2 + $0x58] sm:$0xff]  ;;  %v1005_v49 = vrot.slane %v2684_v8, %v2644_v15 }
 0x582   :  { %860 = vadd.xlane.f32.xlu1 %v859_v53  ;;  %v2222_v28 = vpack.c.bf16 %v672_v30, %v671_v27 }
 0x583   :  { %v852_v54 = vmul.f32 %v848_v52, %v848_v52 }
 0x584   :  { %2223 = vmatprep.subr.bf16.mxu0 %v2222_v28 }
 0x585   :  { %v862_v47 = vsel %vm678_vm2, %v852_v54, 0.0  ;;  %2225 = vmatpush3.bf16.msra.mxu0 %v2222_v28 }
 0x586   :  { %863 = vadd.xlane.f32.xlu0 %v862_v47 }
 0x60a   :  { %v858_v2 = vpop.xlane.xlu0 %857 }
 0x60b   :  { %v866_v3 = vmul.f32 0.125, %v858_v2  ;;  %v855_v57 = vpop.xlane.xlu1 %854 }
 0x60c   :  { %v865_v58 = vmul.f32 0.125, %v855_v57 }
 0x60d   :  { %v870_v4 = vadd.f32 1e-05, %v866_v3 }
 0x60e   :  { %v869_v5 = vadd.f32 1e-05, %v865_v58 }
 0x60f   :  { %2318 = vrsqrt.f32 %v870_v4  ;;  %v861_v7 = vpop.xlane.xlu1 %860 }
 0x610   :  { %2320 = vrsqrt.f32 %v869_v5  ;;  %v867_v59 = vmul.f32 0.125, %v861_v7 }
 0x612   :  { %v871_v9 = vadd.f32 1e-05, %v867_v59 }
 0x613   :  { %v864_v61 = vpop.xlane.xlu0 %863 }
 0x614   :  { %2322 = vrsqrt.f32 %v871_v9  ;;  %v868_v10 = vmul.f32 0.125, %v864_v61 }
 0x616   :  { %v872_v11 = vadd.f32 1e-05, %v868_v10 }
 0x618   :  { %2324 = vrsqrt.f32 %v872_v11 }
 0x619   :  { %v2319_v13 = vpop.eup %2318 }
 0x61a   :  { %v2321_v46 = vpop.eup %2320  ;;  %v878_v1 = vmul.f32 %v2319_v13, %v846_v40 }
 0x61b   :  { %v877_v6 = vmul.f32 %v2321_v46, %v845_v41 }
 0x61c   :  { %v886_v16 = vmul.f32 %v884_v12, %v878_v1 }
 0x61d   :  { %v885_v17 = vmul.f32 %v884_v12, %v877_v6 }
 0x61e   :  { %v2323_v18 = vpop.eup %2322  ;;  %v894_v25 = vadd.f32 %v892_v14, %v886_v16 }
 0x61f   :  { %v893_v19 = vadd.f32 %v892_v14, %v885_v17  ;;  %v879_v20 = vmul.f32 %v2323_v18, %v847_v45 }
 0x621   :  { %2134 = vmatprep.mubr.msk.f32.mxu1 %vm678_vm2, %v893_v19  ;;  %v887_v26 = vmul.f32 %v884_v12, %v879_v20 }
 0x622   :  { %v2325_v21 = vpop.eup %2324  ;;  %2135 = vmatmul.mubr.msk.f32.vlgmr.msra.gmra.mrb[8].mxu1 %vm678_vm2, %v894_v25 }
 0x623   :  { %v895_v31 = vadd.f32 %v892_v14, %v887_v26  ;;  %v880_v32 = vmul.f32 %v2325_v21, %v848_v52 }
 0x625   :  { %2137 = vmatprep.mubr.msk.f32.mxu1 %vm678_vm2, %v895_v31  ;;  %v888_v35 = vmul.f32 %v884_v12, %v880_v32  ;;  %v1176_v32 = vld [vmem:[%s2899_s4] sm:$0xff] }
 0x626   :  { %2154 = vmatprep.subr.mxu1 %v1176_v32 }
 0x627   :  { %v896_v36 = vadd.f32 %v892_v14, %v888_v35  ;;  %2155 = vmatpush3.msra.mxu1 %v1176_v32  ;;  %v1990_v35 = vld [vmem:[%s2897_s2 + $0x60] sm:$0xff] }
 0x629   :  { %2138 = vmatmul.mubr.msk.f32.gmra.mrb[10].mxu1 %vm678_vm2, %v896_v36 }
 0x6f5   :  { %v2136_v38 = vpop.f32.mrb[8].mxu1 }
 0x6f6   :  { %v985_v39 = vadd.f32 %v2136_v38, %v900_v37  ;;  %v979_v40 = vpop.f32.mrb[9].mxu1 }
 0x6f7   :  { %v980_v41 = vadd.f32 %v979_v40, %v900_v37 }
 0x6f8   :  { %v999_v43 = vmax.f32 %v985_v39, 0.0 }
 0x6f9   :  { %v998_v42 = vmax.f32 %v980_v41, 0.0 }
 0x6fb   :  { %2148 = vmatprep.mubr.msk.f32.mxu0 %vm1006_vm3, %v998_v42 }
 0x6fc   :  { %v2139_v44 = vpop.f32.mrb[10].mxu1  ;;  %2149 = vmatmul.mubr.msk.f32.vlgmr.msra.gmra.mrb[12].mxu0 %vm1006_vm3, %v999_v43 }
 0x6fd   :  { %v995_v23 = vadd.f32 %v2139_v44, %v900_v37  ;;  %v989_v33 = vpop.f32.mrb[11].mxu1 }
 0x6fe   :  { %v990_v45 = vadd.f32 %v989_v33, %v900_v37 }
 0x6ff   :  { %v1001_v34 = vmax.f32 %v995_v23, 0.0  ;;  %v2756_v23 = vsub.s32 4, %v2481_v56 }
 0x700   :  { %v1000_v22 = vmax.f32 %v990_v45, 0.0 }
 0x702   :  { %2151 = vmatprep.mubr.msk.f32.mxu0 %vm1006_vm3, %v1000_v22  ;;  %v2759_v22 = vsub.s32 5, %v2481_v56 }
 0x703   :  { %2152 = vmatmul.mubr.msk.f32.gmra.mrb[14].mxu0 %vm1006_vm3, %v1001_v34  ;;  %v1163_v34 = vrot.slane %v2684_v8, %v2756_v23 }
 0x7cf   :  { %v2150_v51 = vpop.f32.mrb[12].mxu0 }
 0x7d0   :  { %v1091_v52 = vadd.f32 %v2150_v51, %v1005_v49  ;;  %v1085_v53 = vpop.f32.mrb[13].mxu0 }
 0x7d1   :  { %v1086_v54 = vadd.f32 %v1085_v53, %v1005_v49 }
 0x7d2   :  { %v1105_v47 = vadd.f32 %v1091_v52, %v894_v25 }
 0x7d3   :  { %v1104_v48 = vadd.f32 %v1086_v54, %v893_v19  ;;  %v1171_v54 = vrot.slane %v2684_v8, %v2759_v22  ;;  %v1992_v8 = vld [vmem:[%s2897_s2 + $0x70] sm:$0xff] }
 0x7d4   :  { %v1111_v55 = vsel %vm678_vm2, %v1105_v47, 0.0 }
 0x7d5   :  { %1112 = vadd.xlane.f32.xlu0 %v1111_v55  ;;  %v1108_v63 = vsel %vm678_vm2, %v1104_v48, 0.0 }
 0x7d6   :  { %1109 = vadd.xlane.f32.xlu1 %v1108_v63  ;;  %v2153_v0 = vpop.f32.mrb[14].mxu0 }
 0x7d7   :  { %v1101_v2 = vadd.f32 %v2153_v0, %v1005_v49  ;;  %v1095_v3 = vpop.f32.mrb[15].mxu0 }
 0x7d8   :  { %v1096_v57 = vadd.f32 %v1095_v3, %v1005_v49 }
 0x7d9   :  { %v1107_v58 = vadd.f32 %v1101_v2, %v896_v36  ;;  %v1991_v36 = vld [vmem:[%s2897_s2 + $0x68] sm:$0xff] }
 0x7da   :  { %v1106_v4 = vadd.f32 %v1096_v57, %v895_v31  ;;  %v2226_v27 = vpack.c.bf16 %v1991_v36, %v1990_v35 }
 0x7db   :  { %v1117_v5 = vsel %vm678_vm2, %v1107_v58, 0.0 }
 0x7dc   :  { %1118 = vadd.xlane.f32.xlu0 %v1117_v5  ;;  %v1114_v7 = vsel %vm678_vm2, %v1106_v4, 0.0  ;;  %2227 = vmatprep.subr.bf16.mxu0 %v2226_v27 }
 0x7dd   :  { %1115 = vadd.xlane.f32.xlu1 %v1114_v7  ;;  %2229 = vmatpush3.bf16.msra.mxu0 %v2226_v27 }
 0x862   :  { %v1113_v59 = vpop.xlane.xlu0 %1112 }
 0x863   :  { %v1121_v9 = vmul.f32 0.125, %v1113_v59  ;;  %v1110_v61 = vpop.xlane.xlu1 %1109  ;;  %v1993_v59 = vld [vmem:[%s2897_s2 + $0x78] sm:$0xff] }
 0x864   :  { %v1120_v10 = vmul.f32 0.125, %v1110_v61  ;;  %v1180_v61 = vrot.slane %v2486_v60, %v2756_v23  ;;  %v2784_v60 = vld [vmem:[%s2898_s3 + $0x8] sm:$0x7f] }
 0x865   :  { %v1125_v11 = vsub.f32 %v1105_v47, %v1121_v9  ;;  %v2230_v9 = vpack.c.bf16 %v1993_v59, %v1992_v8  ;;  %v1996_v8 = vld [vmem:[%s2897_s2 + $0x90] sm:$0xff]  ;;  %v1997_v59 = vld [vmem:[%s2897_s2 + $0x98] sm:$0xff] }
 0x866   :  { %v1124_v12 = vsub.f32 %v1104_v48, %v1120_v10 }
 0x867   :  { %v1129_v13 = vmul.f32 %v1125_v11, %v1125_v11  ;;  %2231 = vmatprep.subr.bf16.mxu0 %v2230_v9 }
 0x868   :  { %v1128_v46 = vmul.f32 %v1124_v12, %v1124_v12  ;;  %2233 = vmatpush3.bf16.msra.mxu0 %v2230_v9  ;;  %v2238_v9 = vpack.c.bf16 %v1997_v59, %v1996_v8 }
 0x869   :  { %v1119_v1 = vpop.xlane.xlu0 %1118  ;;  %v1135_v6 = vsel %vm678_vm2, %v1129_v13, 0.0 }
 0x86a   :  { %v1123_v14 = vmul.f32 0.125, %v1119_v1  ;;  %v1116_v16 = vpop.xlane.xlu1 %1115  ;;  %1136 = vadd.xlane.f32.xlu0 %v1135_v6  ;;  %v1132_v17 = vsel %vm678_vm2, %v1128_v46, 0.0 }
 0x86b   :  { %v1122_v18 = vmul.f32 0.125, %v1116_v16  ;;  %1133 = vadd.xlane.f32.xlu1 %v1132_v17  ;;  %v1296_v16 = vrot.slane %v2784_v60, %v2495_v62 }
 0x86c   :  { %v1127_v19 = vsub.f32 %v1107_v58, %v1123_v14 }
 0x86d   :  { %v1126_v20 = vsub.f32 %v1106_v4, %v1122_v18 }
 0x86e   :  { %v1131_v25 = vmul.f32 %v1127_v19, %v1127_v19 }
 0x86f   :  { %v1130_v26 = vmul.f32 %v1126_v20, %v1126_v20 }
 0x870   :  { %v1141_v21 = vsel %vm678_vm2, %v1131_v25, 0.0 }
 0x871   :  { %1142 = vadd.xlane.f32.xlu0 %v1141_v21  ;;  %v1138_v31 = vsel %vm678_vm2, %v1130_v26, 0.0 }
 0x872   :  { %1139 = vadd.xlane.f32.xlu1 %v1138_v31 }
 0x8f7   :  { %v1137_v30 = vpop.xlane.xlu0 %1136 }
 0x8f8   :  { %v1145_v28 = vmul.f32 0.125, %v1137_v30  ;;  %v1134_v37 = vpop.xlane.xlu1 %1133 }
 0x8f9   :  { %v1144_v38 = vmul.f32 0.125, %v1134_v37 }
 0x8fa   :  { %v1149_v39 = vadd.f32 1e-05, %v1145_v28 }
 0x8fb   :  { %v1148_v40 = vadd.f32 1e-05, %v1144_v38 }
 0x8fc   :  { %2326 = vrsqrt.f32 %v1149_v39 }
 0x8fd   :  { %2328 = vrsqrt.f32 %v1148_v40 }
 0x8fe   :  { %v1143_v41 = vpop.xlane.xlu0 %1142 }
 0x8ff   :  { %v1147_v42 = vmul.f32 0.125, %v1143_v41  ;;  %v1140_v43 = vpop.xlane.xlu1 %1139 }
 0x900   :  { %v1146_v44 = vmul.f32 0.125, %v1140_v43 }
 0x901   :  { %v1151_v33 = vadd.f32 1e-05, %v1147_v42 }
 0x902   :  { %v1150_v45 = vadd.f32 1e-05, %v1146_v44 }
 0x903   :  { %2330 = vrsqrt.f32 %v1151_v33 }
 0x904   :  { %2332 = vrsqrt.f32 %v1150_v45 }
 0x906   :  { %v2327_v49 = vpop.eup %2326 }
 0x907   :  { %v2329_v51 = vpop.eup %2328  ;;  %v1157_v52 = vmul.f32 %v2327_v49, %v1125_v11 }
 0x908   :  { %v1156_v53 = vmul.f32 %v2329_v51, %v1124_v12 }
 0x909   :  { %v1165_v47 = vmul.f32 %v1163_v34, %v1157_v52 }
 0x90a   :  { %v1164_v48 = vmul.f32 %v1163_v34, %v1156_v53 }
 0x90b   :  { %v1173_v0 = vadd.f32 %v1171_v54, %v1165_v47 }
 0x90c   :  { %v1172_v55 = vadd.f32 %v1171_v54, %v1164_v48 }
 0x90d   :  { %v2331_v63 = vpop.eup %2330 }
 0x90e   :  { %v2333_v2 = vpop.eup %2332  ;;  %2156 = vmatprep.mubr.msk.f32.mxu1 %vm678_vm2, %v1172_v55  ;;  %v1159_v3 = vmul.f32 %v2331_v63, %v1127_v19 }
 0x90f   :  { %2157 = vmatmul.mubr.msk.f32.vlgmr.msra.gmra.mrb[12].mxu1 %vm678_vm2, %v1173_v0  ;;  %v1158_v57 = vmul.f32 %v2333_v2, %v1126_v20 }
 0x910   :  { %v1167_v58 = vmul.f32 %v1163_v34, %v1159_v3 }
 0x911   :  { %v1166_v4 = vmul.f32 %v1163_v34, %v1158_v57 }
 0x912   :  { %v1175_v7 = vadd.f32 %v1171_v54, %v1167_v58 }
 0x913   :  { %v1174_v5 = vadd.f32 %v1171_v54, %v1166_v4  ;;  %v1994_v4 = vld [vmem:[%s2897_s2 + $0x80] sm:$0xff] }
 0x915   :  { %2159 = vmatprep.mubr.msk.f32.mxu1 %vm678_vm2, %v1174_v5  ;;  %v1995_v5 = vld [vmem:[%s2897_s2 + $0x88] sm:$0xff] }
 0x916   :  { %2160 = vmatmul.mubr.msk.f32.gmra.mrb[14].mxu1 %vm678_vm2, %v1175_v7  ;;  %v2234_v7 = vpack.c.bf16 %v1995_v5, %v1994_v4 }
 0x918   :  { %2235 = vmatprep.subr.bf16.mxu1 %v2234_v7 }
 0x919   :  { %2237 = vmatpush3.bf16.msra.mxu1 %v2234_v7 }
 0x91a   :  { %2239 = vmatprep.subr.bf16.mxu1 %v2238_v9 }
 0x91d   :  { %2241 = vmatpush3.bf16.msra.mxu1 %v2238_v9 }
 0x9e2   :  { %v2158_v10 = vpop.f32.mrb[12].mxu1 }
 0x9e3   :  { %v1259_v11 = vpop.f32.mrb[13].mxu1  ;;  %v1265_v13 = vadd.f32 %v2158_v10, %v1180_v61  ;;  %v1999_v10 = vld [vmem:[%s2897_s2 + $0xa8] sm:$0xff] }
 0x9e4   :  { %v1260_v12 = vadd.f32 %v1259_v11, %v1180_v61 }
 0x9e6   :  { %2170 = vmatprep.mubr.msk.f32.mxu0 %vm1006_vm3, %v1260_v12 }
 0x9e7   :  { %2171 = vmatmul.mubr.msk.f32.vlgmr.msra.gmra.mrb[16].mxu0 %vm1006_vm3, %v1265_v13 }
 0x9e9   :  { %v2161_v46 = vpop.f32.mrb[14].mxu1 }
 0x9ea   :  { %v1269_v1 = vpop.f32.mrb[15].mxu1  ;;  %v1275_v14 = vadd.f32 %v2161_v46, %v1180_v61 }
 0x9eb   :  { %v1270_v6 = vadd.f32 %v1269_v1, %v1180_v61  ;;  %v1998_v61 = vld [vmem:[%s2897_s2 + $0xa0] sm:$0xff] }
 0x9ec   :  { %v2242_v11 = vpack.c.bf16 %v1999_v10, %v1998_v61 }
 0x9ed   :  { %2173 = vmatprep.mubr.msk.f32.mxu0 %vm1006_vm3, %v1270_v6 }
 0x9ee   :  { %2174 = vmatmul.mubr.msk.f32.gmra.mrb[18].mxu0 %vm1006_vm3, %v1275_v14  ;;  %2243 = vmatprep.subr.bf16.mxu0 %v2242_v11 }
 0x9ef   :  { %2245 = vmatpush3.bf16.msra.mxu0 %v2242_v11 }
 0xaba   :  { %v2172_v17 = vpop.f32.mrb[16].mxu0 }
 0xabb   :  { %v1381_v18 = vadd.f32 %v2172_v17, %v1296_v16  ;;  %v1375_v19 = vpop.f32.mrb[17].mxu0 }
 0xabc   :  { %v1376_v20 = vadd.f32 %v1375_v19, %v1296_v16 }
 0xabd   :  { %2334 = vtanh.f32 %v1381_v18 }
 0xabe   :  { %2336 = vtanh.f32 %v1376_v20 }
 0xac1   :  { %v2175_v25 = vpop.f32.mrb[18].mxu0 }
 0xac2   :  { %v1391_v26 = vadd.f32 %v2175_v25, %v1296_v16  ;;  %v1385_v21 = vpop.f32.mrb[19].mxu0 }
 0xac3   :  { %v1386_v31 = vadd.f32 %v1385_v21, %v1296_v16 }
 0xac4   :  { %2338 = vtanh.f32 %v1391_v26  ;;  %v1458_v26 = vrot.slane %v2784_v60, %v2489_v50 }
 0xac5   :  { %2340 = vtanh.f32 %v1386_v31 }
 0xac7   :  { %v2335_v32 = vpop.eup %2334 }
 0xac8   :  { %v2337_v35 = vpop.eup %2336  ;;  %v1399_v36 = vadd.f32 %v2335_v32, %v1265_v13 }
 0xac9   :  { %v1398_v27 = vadd.f32 %v2337_v35, %v1260_v12 }
 0xaca   :  { %v1405_v30 = vsel %vm1006_vm3, %v1399_v36, 0.0 }
 0xacb   :  { %1406 = vadd.xlane.f32.xlu0 %v1405_v30  ;;  %v1402_v62 = vsel %vm1006_vm3, %v1398_v27, 0.0 }
 0xacc   :  { %1403 = vadd.xlane.f32.xlu1 %v1402_v62 }
 0xace   :  { %v2339_v28 = vpop.eup %2338 }
 0xacf   :  { %v2341_v37 = vpop.eup %2340  ;;  %v1401_v38 = vadd.f32 %v2339_v28, %v1275_v14 }
 0xad0   :  { %v1400_v39 = vadd.f32 %v2341_v37, %v1270_v6 }
 0xad1   :  { %v1411_v40 = vsel %vm1006_vm3, %v1401_v38, 0.0 }
 0xad2   :  { %1412 = vadd.xlane.f32.xlu0 %v1411_v40  ;;  %v1408_v41 = vsel %vm1006_vm3, %v1400_v39, 0.0 }
 0xad3   :  { %1409 = vadd.xlane.f32.xlu1 %v1408_v41 }
 0xb58   :  { %v1407_v42 = vpop.xlane.xlu0 %1406 }
 0xb59   :  { %v1416_v43 = vmul.f32 0.03125, %v1407_v42  ;;  %v1404_v44 = vpop.xlane.xlu1 %1403 }
 0xb5a   :  { %v1415_v33 = vmul.f32 0.03125, %v1404_v44  ;;  %v2001_v44 = vld [vmem:[%s2897_s2 + $0xb8] sm:$0xff] }
 0xb5b   :  { %v1420_v45 = vsub.f32 %v1399_v36, %v1416_v43  ;;  %v1466_v36 = vrot.slane %v2784_v60, %v2653_v24  ;;  %v2000_v24 = vld [vmem:[%s2897_s2 + $0xb0] sm:$0xff] }
 0xb5c   :  { %v1419_v34 = vsub.f32 %v1398_v27, %v1415_v33  ;;  %v2246_v33 = vpack.c.bf16 %v2001_v44, %v2000_v24 }
 0xb5d   :  { %v1424_v49 = vmul.f32 %v1420_v45, %v1420_v45 }
 0xb5e   :  { %v1423_v51 = vmul.f32 %v1419_v34, %v1419_v34  ;;  %2247 = vmatprep.subr.bf16.mxu0 %v2246_v33 }
 0xb5f   :  { %v1413_v52 = vpop.xlane.xlu0 %1412  ;;  %v1430_v53 = vsel %vm1006_vm3, %v1424_v49, 0.0  ;;  %2249 = vmatpush3.bf16.msra.mxu0 %v2246_v33 }
 0xb60   :  { %v1418_v54 = vmul.f32 0.03125, %v1413_v52  ;;  %v1410_v47 = vpop.xlane.xlu1 %1409  ;;  %1431 = vadd.xlane.f32.xlu0 %v1430_v53  ;;  %v1427_v48 = vsel %vm1006_vm3, %v1423_v51, 0.0 }
 0xb61   :  { %v1417_v55 = vmul.f32 0.03125, %v1410_v47  ;;  %1428 = vadd.xlane.f32.xlu1 %v1427_v48 }
 0xb62   :  { %v1422_v63 = vsub.f32 %v1401_v38, %v1418_v54 }
 0xb63   :  { %v1421_v0 = vsub.f32 %v1400_v39, %v1417_v55 }
 0xb64   :  { %v1426_v2 = vmul.f32 %v1422_v63, %v1422_v63 }
 0xb65   :  { %v1425_v3 = vmul.f32 %v1421_v0, %v1421_v0 }
 0xb66   :  { %v1436_v57 = vsel %vm1006_vm3, %v1426_v2, 0.0 }
 0xb67   :  { %1437 = vadd.xlane.f32.xlu0 %v1436_v57  ;;  %v1433_v58 = vsel %vm1006_vm3, %v1425_v3, 0.0  ;;  %v1579_v3 = vrot.slane %v2784_v60, %v2644_v15 }
 0xb68   :  { %1434 = vadd.xlane.f32.xlu1 %v1433_v58 }
 0xbed   :  { %v1432_v12 = vpop.xlane.xlu0 %1431 }
 0xbee   :  { %v1440_v13 = vmul.f32 0.03125, %v1432_v12  ;;  %v1429_v46 = vpop.xlane.xlu1 %1428 }
 0xbef   :  { %v1439_v1 = vmul.f32 0.03125, %v1429_v46 }
 0xbf0   :  { %v1444_v6 = vadd.f32 1e-05, %v1440_v13 }
 0xbf1   :  { %v1443_v14 = vadd.f32 1e-05, %v1439_v1 }
 0xbf2   :  { %2342 = vrsqrt.f32 %v1444_v6 }
 0xbf3   :  { %2344 = vrsqrt.f32 %v1443_v14 }
 0xbf4   :  { %v1438_v16 = vpop.xlane.xlu0 %1437 }
 0xbf5   :  { %v1442_v17 = vmul.f32 0.03125, %v1438_v16  ;;  %v1435_v18 = vpop.xlane.xlu1 %1434 }
 0xbf6   :  { %v1441_v19 = vmul.f32 0.03125, %v1435_v18 }
 0xbf7   :  { %v1446_v20 = vadd.f32 1e-05, %v1442_v17 }
 0xbf8   :  { %v1445_v25 = vadd.f32 1e-05, %v1441_v19 }
 0xbf9   :  { %2346 = vrsqrt.f32 %v1446_v20 }
 0xbfa   :  { %2348 = vrsqrt.f32 %v1445_v25 }
 0xbfc   :  { %v2343_v21 = vpop.eup %2342 }
 0xbfd   :  { %v2345_v31 = vpop.eup %2344  ;;  %v1452_v32 = vmul.f32 %v2343_v21, %v1420_v45  ;;  %v1474_v45 = vrot.slane %v2784_v60, %v2728_v29 }
 0xbfe   :  { %v1451_v35 = vmul.f32 %v2345_v31, %v1419_v34 }
 0xbff   :  { %v1460_v27 = vmul.f32 %v1458_v26, %v1452_v32 }
 0xc00   :  { %v1459_v30 = vmul.f32 %v1458_v26, %v1451_v35 }
 0xc01   :  { %v1468_v37 = vadd.f32 %v1466_v36, %v1460_v27 }
 0xc02   :  { %v1467_v62 = vadd.f32 %v1466_v36, %v1459_v30 }
 0xc03   :  { %v2347_v28 = vpop.eup %2346 }
 0xc04   :  { %v2349_v38 = vpop.eup %2348  ;;  %2184 = vmatprep.mubr.msk.f32.mxu1 %vm1006_vm3, %v1467_v62  ;;  %v1454_v39 = vmul.f32 %v2347_v28, %v1422_v63 }
 0xc05   :  { %2185 = vmatmul.mubr.msk.f32.vlgmr.msra.gmra.mrb[16].mxu1 %vm1006_vm3, %v1468_v37  ;;  %v1453_v40 = vmul.f32 %v2349_v38, %v1421_v0 }
 0xc06   :  { %v1462_v50 = vmul.f32 %v1458_v26, %v1454_v39 }
 0xc07   :  { %v1461_v41 = vmul.f32 %v1458_v26, %v1453_v40 }
 0xc08   :  { %v1470_v43 = vadd.f32 %v1466_v36, %v1462_v50 }
 0xc09   :  { %v1469_v42 = vadd.f32 %v1466_v36, %v1461_v41 }
 0xc0b   :  { %2187 = vmatprep.mubr.msk.f32.mxu1 %vm1006_vm3, %v1469_v42 }
 0xc0c   :  { %2188 = vmatmul.mubr.msk.f32.gmra.mrb[18].mxu1 %vm1006_vm3, %v1470_v43 }
 0xcd8   :  { %v2186_v34 = vpop.f32.mrb[16].mxu1 }
 0xcd9   :  { %v1559_v49 = vadd.f32 %v2186_v34, %v1474_v45  ;;  %v1553_v51 = vpop.f32.mrb[17].mxu1 }
 0xcda   :  { %v1554_v52 = vadd.f32 %v1553_v51, %v1474_v45  ;;  %v1736_v51 = vrot.slane %v2784_v60, %v2756_v23 }
 0xcdb   :  { %v1573_v54 = vmax.f32 %v1559_v49, 0.0 }
 0xcdc   :  { %v1572_v53 = vmax.f32 %v1554_v52, 0.0 }
 0xcde   :  { %2198 = vmatprep.mubr.msk.f32.mxu0 %vm1006_vm3, %v1572_v53 }
 0xcdf   :  { %v2189_v47 = vpop.f32.mrb[18].mxu1  ;;  %2199 = vmatmul.mubr.msk.f32.vlgmr.msra.gmra.mrb[20].mxu0 %vm1006_vm3, %v1573_v54 }
 0xce0   :  { %v1569_v48 = vadd.f32 %v2189_v47, %v1474_v45  ;;  %v1563_v55 = vpop.f32.mrb[19].mxu1  ;;  %v1744_v47 = vrot.slane %v2784_v60, %v2759_v22 }
 0xce1   :  { %v1564_v63 = vadd.f32 %v1563_v55, %v1474_v45 }
 0xce2   :  { %v1575_v2 = vmax.f32 %v1569_v48, 0.0 }
 0xce3   :  { %v1574_v0 = vmax.f32 %v1564_v63, 0.0 }
 0xce5   :  { %2201 = vmatprep.mubr.msk.f32.mxu0 %vm1006_vm3, %v1574_v0 }
 0xce6   :  { %2202 = vmatmul.mubr.msk.f32.gmra.mrb[22].mxu0 %vm1006_vm3, %v1575_v2 }
 0xdb2   :  { %v2200_v57 = vpop.f32.mrb[20].mxu0 }
 0xdb3   :  { %v1664_v58 = vadd.f32 %v2200_v57, %v1579_v3  ;;  %v1658_v4 = vpop.f32.mrb[21].mxu0 }
 0xdb4   :  { %v1659_v5 = vadd.f32 %v1658_v4, %v1579_v3 }
 0xdb5   :  { %v1678_v7 = vadd.f32 %v1664_v58, %v1468_v37 }
 0xdb6   :  { %v1677_v8 = vadd.f32 %v1659_v5, %v1467_v62 }
 0xdb7   :  { %v1684_v59 = vsel %vm1006_vm3, %v1678_v7, 0.0 }
 0xdb8   :  { %1685 = vadd.xlane.f32.xlu0 %v1684_v59  ;;  %v1681_v9 = vsel %vm1006_vm3, %v1677_v8, 0.0 }
 0xdb9   :  { %1682 = vadd.xlane.f32.xlu1 %v1681_v9  ;;  %v2203_v61 = vpop.f32.mrb[22].mxu0 }
 0xdba   :  { %v1674_v10 = vadd.f32 %v2203_v61, %v1579_v3  ;;  %v1668_v11 = vpop.f32.mrb[23].mxu0 }
 0xdbb   :  { %v1669_v12 = vadd.f32 %v1668_v11, %v1579_v3 }
 0xdbc   :  { %v1680_v13 = vadd.f32 %v1674_v10, %v1470_v43 }
 0xdbd   :  { %v1679_v46 = vadd.f32 %v1669_v12, %v1469_v42 }
 0xdbe   :  { %v1690_v15 = vsel %vm1006_vm3, %v1680_v13, 0.0 }
 0xdbf   :  { %1691 = vadd.xlane.f32.xlu0 %v1690_v15  ;;  %v1687_v1 = vsel %vm1006_vm3, %v1679_v46, 0.0 }
 0xdc0   :  { %1688 = vadd.xlane.f32.xlu1 %v1687_v1 }
 0xe45   :  { %v1686_v6 = vpop.xlane.xlu0 %1685 }
 0xe46   :  { %v1694_v14 = vmul.f32 0.03125, %v1686_v6  ;;  %v1683_v16 = vpop.xlane.xlu1 %1682 }
 0xe47   :  { %v1693_v17 = vmul.f32 0.03125, %v1683_v16 }
 0xe48   :  { %v1698_v18 = vsub.f32 %v1678_v7, %v1694_v14 }
 0xe49   :  { %v1697_v19 = vsub.f32 %v1677_v8, %v1693_v17 }
 0xe4a   :  { %v1702_v20 = vmul.f32 %v1698_v18, %v1698_v18 }
 0xe4b   :  { %v1701_v25 = vmul.f32 %v1697_v19, %v1697_v19 }
 0xe4c   :  { %v1692_v26 = vpop.xlane.xlu0 %1691  ;;  %v1708_v21 = vsel %vm1006_vm3, %v1702_v20, 0.0 }
 0xe4d   :  { %v1696_v31 = vmul.f32 0.03125, %v1692_v26  ;;  %v1689_v32 = vpop.xlane.xlu1 %1688  ;;  %1709 = vadd.xlane.f32.xlu0 %v1708_v21  ;;  %v1705_v35 = vsel %vm1006_vm3, %v1701_v25, 0.0 }
 0xe4e   :  { %v1695_v36 = vmul.f32 0.03125, %v1689_v32  ;;  %1706 = vadd.xlane.f32.xlu1 %v1705_v35 }
 0xe4f   :  { %v1700_v27 = vsub.f32 %v1680_v13, %v1696_v31 }
 0xe50   :  { %v1699_v30 = vsub.f32 %v1679_v46, %v1695_v36  ;;  %v2015_v36 = vld [vmem:[%s2899_s4 + $0x20] sm:$0xff] }
 0xe51   :  { %v1704_v62 = vmul.f32 %v1700_v27, %v1700_v27 }
 0xe52   :  { %v1703_v28 = vmul.f32 %v1699_v30, %v1699_v30 }
 0xe53   :  { %v1714_v37 = vsel %vm1006_vm3, %v1704_v62, 0.0  ;;  %v2017_v62 = vld [vmem:[%s2899_s4 + $0x30] sm:$0xff] }
 0xe54   :  { %1715 = vadd.xlane.f32.xlu0 %v1714_v37  ;;  %v1711_v38 = vsel %vm1006_vm3, %v1703_v28, 0.0  ;;  %v2018_v28 = vld [vmem:[%s2899_s4 + $0x38] sm:$0xff] }
 0xe55   :  { %1712 = vadd.xlane.f32.xlu1 %v1711_v38  ;;  %v2254_v37 = vpack.c.bf16 %v2018_v28, %v2017_v62 }
 0xeda   :  { %v1710_v39 = vpop.xlane.xlu0 %1709 }
 0xedb   :  { %v1718_v40 = vmul.f32 0.03125, %v1710_v39  ;;  %v1707_v50 = vpop.xlane.xlu1 %1706 }
 0xedc   :  { %v1717_v41 = vmul.f32 0.03125, %v1707_v50 }
 0xedd   :  { %v1722_v42 = vadd.f32 1e-05, %v1718_v40 }
 0xede   :  { %v1721_v43 = vadd.f32 1e-05, %v1717_v41 }
 0xedf   :  { %2350 = vrsqrt.f32 %v1722_v42 }
 0xee0   :  { %2352 = vrsqrt.f32 %v1721_v43 }
 0xee1   :  { %v1716_v24 = vpop.xlane.xlu0 %1715 }
 0xee2   :  { %v1720_v44 = vmul.f32 0.03125, %v1716_v24  ;;  %v1713_v33 = vpop.xlane.xlu1 %1712 }
 0xee3   :  { %v1719_v45 = vmul.f32 0.03125, %v1713_v33 }
 0xee4   :  { %v1724_v34 = vadd.f32 1e-05, %v1720_v44 }
 0xee5   :  { %v1723_v49 = vadd.f32 1e-05, %v1719_v45 }
 0xee6   :  { %2354 = vrsqrt.f32 %v1724_v34 }
 0xee7   :  { %2356 = vrsqrt.f32 %v1723_v49  ;;  %v2366_v49 = vld [vmem:[%s2896_s5] sm:$0xff] }
 0xee9   :  { %v2351_v52 = vpop.eup %2350 }
 0xeea   :  { %v2353_v53 = vpop.eup %2352  ;;  %v1730_v54 = vmul.f32 %v2351_v52, %v1698_v18 }
 0xeeb   :  { %v1729_v48 = vmul.f32 %v2353_v53, %v1697_v19 }
 0xeec   :  { %v1738_v55 = vmul.f32 %v1736_v51, %v1730_v54 }
 0xeed   :  { %v1737_v63 = vmul.f32 %v1736_v51, %v1729_v48  ;;  %v1812_v48 = vrot.slane %v2366_v49, %v2728_v29  ;;  %v1824_v29 = vsub.s32 7, %v2481_v56 }
 0xeee   :  { %v1746_v0 = vadd.f32 %v1744_v47, %v1738_v55 }
 0xeef   :  { %v1745_v2 = vadd.f32 %v1744_v47, %v1737_v63 }
 0xef0   :  { %v2355_v3 = vpop.eup %2354  ;;  %v1752_v57 = vsel %vm1006_vm3, %v1746_v0, 0.0 }
 0xef1   :  { %v2357_v58 = vpop.eup %2356  ;;  %1753 = vadd.xlane.f32.xlu0 %v1752_v57  ;;  %v1749_v4 = vsel %vm1006_vm3, %v1745_v2, 0.0  ;;  %v1732_v5 = vmul.f32 %v2355_v3, %v1700_v27  ;;  %v2016_v27 = vld [vmem:[%s2899_s4 + $0x28] sm:$0xff] }
 0xef2   :  { %1750 = vadd.xlane.f32.xlu1 %v1749_v4  ;;  %v1731_v23 = vmul.f32 %v2357_v58, %v1699_v30  ;;  %v2250_v30 = vpack.c.bf16 %v2016_v27, %v2015_v36 }
 0xef3   :  { %v1740_v7 = vmul.f32 %v1736_v51, %v1732_v5 }
 0xef4   :  { %v1739_v8 = vmul.f32 %v1736_v51, %v1731_v23  ;;  %2251 = vmatprep.subr.bf16.mxu1 %v2250_v30  ;;  %v1804_v51 = vrot.slane %v2366_v49, %v2759_v22 }
 0xef5   :  { %v1748_v59 = vadd.f32 %v1744_v47, %v1740_v7  ;;  %2253 = vmatpush3.bf16.msra.mxu1 %v2250_v30 }
 0xef6   :  { %v1747_v9 = vadd.f32 %v1744_v47, %v1739_v8  ;;  %2255 = vmatprep.subr.bf16.mxu1 %v2254_v37  ;;  %v1825_v8 = vrot.slane %v2366_v49, %v1824_v29 }
 0xef7   :  { %v1758_v60 = vsel %vm1006_vm3, %v1748_v59, 0.0 }
 0xef8   :  { %1759 = vadd.xlane.f32.xlu0 %v1758_v60  ;;  %v1755_v61 = vsel %vm1006_vm3, %v1747_v9, 0.0 }
 0xef9   :  { %1756 = vadd.xlane.f32.xlu1 %v1755_v61  ;;  %2257 = vmatpush3.bf16.msra.mxu1 %v2254_v37 }
 0xf7e   :  { %v1754_v10 = vpop.xlane.xlu0 %1753 }
 0xf7f   :  { %v1762_v11 = vmul.f32 0.03125, %v1754_v10  ;;  %v1751_v12 = vpop.xlane.xlu1 %1750 }
 0xf80   :  { %v1761_v13 = vmul.f32 0.03125, %v1751_v12 }
 0xf81   :  { %v1766_v46 = vsub.f32 %v1746_v0, %v1762_v11 }
 0xf82   :  { %v1765_v15 = vsub.f32 %v1745_v2, %v1761_v13 }
 0xf83   :  { %v1770_v1 = vmul.f32 %v1766_v46, %v1766_v46 }
 0xf84   :  { %v1769_v6 = vmul.f32 %v1765_v15, %v1765_v15 }
 0xf85   :  { %v1760_v14 = vpop.xlane.xlu0 %1759  ;;  %v1776_v16 = vsel %vm1006_vm3, %v1770_v1, 0.0 }
 0xf86   :  { %v1764_v17 = vmul.f32 0.03125, %v1760_v14  ;;  %v1757_v18 = vpop.xlane.xlu1 %1756  ;;  %1777 = vadd.xlane.f32.xlu0 %v1776_v16  ;;  %v1773_v19 = vsel %vm1006_vm3, %v1769_v6, 0.0 }
 0xf87   :  { %v1763_v20 = vmul.f32 0.03125, %v1757_v18  ;;  %1774 = vadd.xlane.f32.xlu1 %v1773_v19 }
 0xf88   :  { %v1768_v25 = vsub.f32 %v1748_v59, %v1764_v17 }
 0xf89   :  { %v1767_v26 = vsub.f32 %v1747_v9, %v1763_v20 }
 0xf8a   :  { %v1772_v21 = vmul.f32 %v1768_v25, %v1768_v25 }
 0xf8b   :  { %v1771_v31 = vmul.f32 %v1767_v26, %v1767_v26 }
 0xf8c   :  { %v1782_v32 = vsel %vm1006_vm3, %v1772_v21, 0.0 }
 0xf8d   :  { %1783 = vadd.xlane.f32.xlu0 %v1782_v32  ;;  %v1779_v35 = vsel %vm1006_vm3, %v1771_v31, 0.0 }
 0xf8e   :  { %1780 = vadd.xlane.f32.xlu1 %v1779_v35 }
0x1013   :  { %v1778_v38 = vpop.xlane.xlu0 %1777 }
0x1014   :  { %v1786_v39 = vmul.f32 0.03125, %v1778_v38  ;;  %v1775_v40 = vpop.xlane.xlu1 %1774 }
0x1015   :  { %v1785_v50 = vmul.f32 0.03125, %v1775_v40 }
0x1016   :  { %v1790_v41 = vadd.f32 1e-05, %v1786_v39 }
0x1017   :  { %v1789_v42 = vadd.f32 1e-05, %v1785_v50 }
0x1018   :  { %2358 = vrsqrt.f32 %v1790_v41 }
0x1019   :  { %2360 = vrsqrt.f32 %v1789_v42 }
0x101a   :  { %v1784_v43 = vpop.xlane.xlu0 %1783 }
0x101b   :  { %v1788_v24 = vmul.f32 0.03125, %v1784_v43  ;;  %v1781_v44 = vpop.xlane.xlu1 %1780 }
0x101c   :  { %v1787_v33 = vmul.f32 0.03125, %v1781_v44 }
0x101d   :  { %v1792_v45 = vadd.f32 1e-05, %v1788_v24 }
0x101e   :  { %v1791_v34 = vadd.f32 1e-05, %v1787_v33 }
0x101f   :  { %2362 = vrsqrt.f32 %v1792_v45 }
0x1020   :  { %2364 = vrsqrt.f32 %v1791_v34 }
0x1022   :  { %v2359_v52 = vpop.eup %2358 }
0x1023   :  { %v2361_v53 = vpop.eup %2360  ;;  %v1798_v54 = vmul.f32 %v2359_v52, %v1766_v46 }
0x1024   :  { %v1797_v47 = vmul.f32 %v2361_v53, %v1765_v15 }
0x1025   :  { %v1806_v55 = vmul.f32 %v1804_v51, %v1798_v54 }
0x1026   :  { %v1805_v63 = vmul.f32 %v1804_v51, %v1797_v47 }
0x1027   :  { %v1814_v3 = vadd.f32 %v1812_v48, %v1806_v55 }
0x1028   :  { %v1813_v0 = vadd.f32 %v1812_v48, %v1805_v63 }
0x1029   :  { %v2363_v2 = vpop.eup %2362 }
0x102a   :  { %v2365_v57 = vpop.eup %2364  ;;  %2212 = vmatprep.mubr.msk.f32.mxu1 %vm1006_vm3, %v1813_v0  ;;  %v1800_v58 = vmul.f32 %v2363_v2, %v1768_v25 }
0x102b   :  { %2213 = vmatmul.mubr.msk.f32.vlgmr.msra.gmra.mrb[20].mxu1 %vm1006_vm3, %v1814_v3  ;;  %v1799_v4 = vmul.f32 %v2365_v57, %v1767_v26 }
0x102c   :  { %v1808_v5 = vmul.f32 %v1804_v51, %v1800_v58 }
0x102d   :  { %v1807_v22 = vmul.f32 %v1804_v51, %v1799_v4 }
0x102e   :  { %v1816_v7 = vadd.f32 %v1812_v48, %v1808_v5 }
0x102f   :  { %v1815_v23 = vadd.f32 %v1812_v48, %v1807_v22 }
0x1031   :  { %2215 = vmatprep.mubr.msk.f32.mxu1 %vm1006_vm3, %v1815_v23 }
0x1032   :  { %2216 = vmatmul.mubr.msk.f32.gmra.mrb[22].mxu1 %vm1006_vm3, %v1816_v7 }
0x10fe   :  { %v2214_v59 = vpop.f32.mrb[20].mxu1 }
0x10ff   :  { %v1910_v9 = vadd.f32 %v2214_v59, %v1825_v8  ;;  %v1904_v60 = vpop.f32.mrb[21].mxu1 }
0x1100   :  { %v1905_v61 = vadd.f32 %v1904_v60, %v1825_v8 }
0x1101   :  { %1924 = vst.msk [vmem:[%s2900_s6 + $0x8] sm:$0xff] %vm37_vm1, %v1910_v9 }
0x1102   :  { %1923 = vst.msk [vmem:[%s2900_s6] sm:$0xff] %vm37_vm1, %v1905_v61 }
0x1105   :  { %v2217_v10 = vpop.f32.mrb[22].mxu1 }
0x1106   :  { %v1920_v11 = vadd.f32 %v2217_v10, %v1825_v8  ;;  %v1914_v12 = vpop.f32.mrb[23].mxu1 }
0x1107   :  { %v1915_v13 = vadd.f32 %v1914_v12, %v1825_v8 }
0x1108   :  { %1926 = vst.msk [vmem:[%s2900_s6 + $0x18] sm:$0xff] %vm37_vm1, %v1920_v11 }
0x1109   :  { %1925 = vst.msk [vmem:[%s2900_s6 + $0x10] sm:$0xff] %vm37_vm1, %v1915_v13 }

</bundles_post_ra>
